<compile_context>
chip_gen: v7x
topology: tpu7x:2x2x1
jax: 0.10.0
libtpu: 0.0.40
codegen_flags: <defaults>
</compile_context>

<pallas_src>
import functools

import jax
import jax.numpy as jnp
from jax.experimental import pallas as pl
from jax.experimental.pallas import tpu as pltpu


def _mha_tri_kernel(x_ref, tx_ref, wtq_ref, wk_ref, wv_ref, woutT_ref, o_ref,
                    kv_ref, *, head_num):
    """One (batch b, q-tile qi) grid step.

    x_ref    : (1, T,  E) bf16  key/value source sequence (batch b)
    tx_ref   : (1, Tq, E) bf16  query source tile          (batch b, tile qi)
    wtq_ref  : (E, E)     bf16  fused tquery weights, cols (h d), sqrt(D) folded in
    wk_ref   : (E, E)     bf16  fused key   weights, cols (h d)
    wv_ref   : (E, E)     bf16  fused value weights, cols (h d)
    woutT_ref: (E, E)     bf16  out_attention.weight.T, rows (h d)
    o_ref    : (1, Tq, E)       output tile
    kv_ref   : (2, T, E)  bf16  per-batch K/V cache (VMEM scratch, carried over qi)
    """
    H = head_num
    E = x_ref.shape[-1]
    D = E // H
    qi = pl.program_id(1)

    # ---- K/V projection once per batch (qi is the inner, sequential axis) ----
    @pl.when(qi == 0)
    def _():
        x_b = x_ref[0]                                                  # (T, E) bf16
        kv_ref[0] = jnp.dot(x_b, wk_ref[...],
                            preferred_element_type=jnp.float32).astype(jnp.bfloat16)
        kv_ref[1] = jnp.dot(x_b, wv_ref[...],
                            preferred_element_type=jnp.float32).astype(jnp.bfloat16)

    # ---- Q projection for this tile (sqrt(D) already folded into wtq) ----
    q_all = jnp.dot(tx_ref[0], wtq_ref[...],
                    preferred_element_type=jnp.float32).astype(jnp.bfloat16)   # (Tq, E)
    k_all = kv_ref[0]                                                          # (T,  E)
    v_all = kv_ref[1]                                                          # (T,  E)

    heads = []
    # Static unroll over heads (small H). For H >= ~8 switch to lax.fori_loop
    # with a VMEM scratch accumulator to bound live ranges.
    for h in range(H):
        lo = h * D
        q_h = q_all[:, lo:lo + D]                                              # (Tq, D)
        k_h = k_all[:, lo:lo + D]                                              # (T,  D)
        v_h = v_all[:, lo:lo + D]                                              # (T,  D)

        # energy = einsum('id,jd->ij', tquery, key) * dk  (dk folded into wtq)
        energy = jax.lax.dot_general(
            q_h, k_h, (((1,), (1,)), ((), ())),
            preferred_element_type=jnp.float32)                                # (Tq, T)

        # f32 softmax, normalization deferred past the PV matmul (O(Tq*D) work).
        m = jnp.max(energy, axis=-1, keepdims=True)
        e = jnp.exp(energy - m)                                                # (Tq, T)
        denom = jnp.sum(e, axis=-1, keepdims=True)                             # (Tq, 1)
        pv = jnp.dot(e.astype(jnp.bfloat16), v_h,
                     preferred_element_type=jnp.float32)                       # (Tq, D)
        head = pv * pl.reciprocal(denom, approx=True)                          # EUP slot
        heads.append(head.astype(jnp.bfloat16))

    # Concat over heads gives the module's 'b t (h d)' ordering; one full-depth
    # out-projection matmul replaces H shallow K=D matmuls.
    o_heads = jnp.concatenate(heads, axis=-1)                                  # (Tq, E) bf16
    out = jnp.dot(o_heads, woutT_ref[...], preferred_element_type=jnp.float32)
    o_ref[0] = out.astype(o_ref.dtype)


def pack_mha_tri_weights(w_qkv, w_tqkv, w_out, head_num, *, dtype=jnp.bfloat16):
    """One-time (init-side) repacking of the torch Linear weights.

    Returns (wtq_scaled, wk, wv, woutT) with columns ordered (h d), bf16,
    and the module's MULTIPLICATIVE sqrt(D) factor folded into wtq.
    """
    E = w_out.shape[0]
    H = head_num
    assert E % H == 0
    D = E // H
    scale = float(D) ** 0.5  # self.dk — MULTIPLIED, exactly as in the module

    # Linear output column c = d*3*H + k*H + h  (einops 'b t (d k h)').
    def per_k(w, k_idx):
        wt = jnp.transpose(w).reshape(E, D, 3, H)                   # (in, d, k, h)
        return jnp.transpose(wt[:, :, k_idx, :], (0, 2, 1)).reshape(E, E)  # cols (h d)

    wtq = per_k(w_tqkv, 0) * scale     # tquery from tx, dk folded in
    wk = per_k(w_qkv, 1)               # key    from x
    wv = per_k(w_qkv, 2)               # value  from x
    # Final rearrange is 'b h t d -> b t (h d)', so Wout.T rows are already (h d).
    woutT = jnp.transpose(w_out)
    return tuple(w.astype(dtype) for w in (wtq, wk, wv, woutT))


def mha_tri_pallas(x, tx, packed_weights, head_num, *, q_tile=None,
                   out_dtype=jnp.bfloat16):
    """Pallas implementation of MultiHeadAttention_tri.forward(x, tx).

    x  : (B, T,  E) key/value source;  tx : (B, Tt, E) query source.
    packed_weights: output of pack_mha_tri_weights (hoisted to model init).
    """
    wtq, wk, wv, woutT = packed_weights
    B, T, E = x.shape
    Tt = tx.shape[1]
    H = head_num
    assert E % H == 0
    D = E // H

    cdt = jnp.bfloat16   # MXU operands; accumulation / softmax stay f32 in-kernel
    xb, txb = x.astype(cdt), tx.astype(cdt)
    out_itemsize = jnp.dtype(out_dtype).itemsize

    # ---- per-core VMEM capacity (v5e/v6e: 128 MiB, v7x: 64 MiB) ----
    try:
        phys = int(pltpu.get_tpu_info().vmem_capacity_bytes)
    except Exception:
        phys = 64 * 1024 * 1024
    vmem_cap = (phys * 3) // 4          # ~96 MiB on 128 MiB parts, ~48 MiB on v7x

    def working_set_bytes(tq, weight_bufs):
        return (2 * T * E * 2                  # x block (double-buffered, bf16)
                + 2 * tq * E * 2               # tx block (double-buffered, bf16)
                + weight_bufs * 4 * E * E * 2  # wtq/wk/wv/woutT slabs, bf16
                + 2 * T * E * 2                # (2, T, E) bf16 K/V scratch
                + 2 * tq * E * out_itemsize    # output block, double-buffered
                + 2 * tq * T * 4               # energy / exp f32 temporaries
                + 3 * tq * E * 4)              # q_all / concat / out-proj temporaries

    # ---- real default q-tile: <=256 rows, multiple of 8, divides Tt, fits VMEM ----
    def pick_q_tile():
        if (q_tile is not None and q_tile > 0 and Tt % q_tile == 0
                and (q_tile % 8 == 0 or q_tile == Tt)):
            return q_tile
        cands = [c for c in range(min(Tt, 256), 0, -1)
                 if Tt % c == 0 and (c % 8 == 0 or c == Tt)]
        if not cands:
            cands = [Tt]
        for c in cands:
            if working_set_bytes(c, 1) <= (vmem_cap * 3) // 5:
                return c
        return cands[-1]

    tq = pick_q_tile()
    n_qt = Tt // tq
    # TODO(synk): add a flash-style KV-tiled (online-softmax) inner axis when the
    # full-T K/V scratch + (tq, T) score plane no longer fits the VMEM budget.

    cost = pl.CostEstimate(
        flops=2 * B * (Tt * E * E              # Q projection
                       + 2 * T * E * E         # K/V projection (once per batch)
                       + 2 * H * Tt * T * D    # QK^T + PV
                       + Tt * E * E),          # output projection
        transcendentals=B * H * Tt * T,        # exp
        bytes_accessed=(x.size + tx.size) * 2 + 4 * E * E * 2
                       + B * Tt * E * out_itemsize,
    )

    kernel = functools.partial(_mha_tri_kernel, head_num=H)

    def build(single_buffer_weights):
        if single_buffer_weights:
            def w_spec(shape):
                return pl.BlockSpec(shape, lambda b, qi: (0, 0),
                                    pipeline_mode=pl.Buffered(1))
            wbufs = 1
        else:
            def w_spec(shape):
                return pl.BlockSpec(shape, lambda b, qi: (0, 0))
            wbufs = 2
        vmem_limit = int(min(vmem_cap,
                             max(32 * 1024 * 1024,
                                 2 * working_set_bytes(tq, wbufs))))
        return pl.pallas_call(
            kernel,
            out_shape=jax.ShapeDtypeStruct((B, Tt, E), out_dtype),
            grid_spec=pltpu.PrefetchScalarGridSpec(
                num_scalar_prefetch=0,
                grid=(B, n_qt),
                in_specs=[
                    pl.BlockSpec((1, T, E), lambda b, qi: (b, 0, 0)),    # x  (K/V src)
                    pl.BlockSpec((1, tq, E), lambda b, qi: (b, qi, 0)),  # tx (Q tile)
                    w_spec((E, E)),                                      # Wtq (scaled)
                    w_spec((E, E)),                                      # Wk
                    w_spec((E, E)),                                      # Wv
                    w_spec((E, E)),                                      # WoutT
                ],
                out_specs=pl.BlockSpec((1, tq, E), lambda b, qi: (b, qi, 0)),
                scratch_shapes=[pltpu.VMEM((2, T, E), jnp.bfloat16)],    # K/V cache
            ),
            compiler_params=pltpu.CompilerParams(
                # qi carries the per-batch K/V scratch -> must be sequential.
                dimension_semantics=("parallel", "arbitrary"),
                vmem_limit_bytes=vmem_limit),
            cost_estimate=cost,
        )

    try:
        return build(True)(xb, txb, wtq, wk, wv, woutT)
    except Exception:
        # Fallback if Buffered(1) single-buffering isn't supported by this JAX.
        return build(False)(xb, txb, wtq, wk, wv, woutT)


def mha_tri_reference(x, tx, w_qkv, w_tqkv, w_out, head_num):
    """Pure-JAX f32 mirror of the PyTorch forward (for correctness checking)."""
    B, T, E = x.shape
    Tt = tx.shape[1]
    H = head_num
    D = E // H
    dk = float(D) ** 0.5

    qkv = x @ w_qkv.T        # (B, T, 3E)
    tqkv = tx @ w_tqkv.T     # (B, Tt, 3E)

    def split(z):
        b, t, _ = z.shape
        z = z.reshape(b, t, D, 3, H)              # (d k h)
        z = jnp.transpose(z, (3, 0, 4, 1, 2))     # k b h t d
        return z[0], z[1], z[2]

    _q, k, v = split(qkv)
    tq, _tk, _tv = split(tqkv)

    energy = jnp.einsum('bhid,bhjd->bhij', tq, k) * dk   # MULTIPLIED, as in module
    attn = jax.nn.softmax(energy, axis=-1)
    o = jnp.einsum('bhij,bhjd->bhid', attn, v)
    o = jnp.transpose(o, (0, 2, 1, 3)).reshape(B, Tt, E)  # b t (h d)
    return o @ w_out.T


if __name__ == "__main__":
    B, T, Tt, E, H = 2, 16, 8, 32, 4

    key = jax.random.PRNGKey(0)
    k1, k2, k3, k4, k5 = jax.random.split(key, 5)

    x = jax.random.normal(k1, (B, T, E), dtype=jnp.float32)
    tx = jax.random.normal(k2, (B, Tt, E), dtype=jnp.float32)
    # Deterministic synthetic weights (shapes match torch nn.Linear .weight).
    w_qkv = jax.random.normal(k3, (3 * E, E), dtype=jnp.float32) * 0.1
    w_tqkv = jax.random.normal(k4, (3 * E, E), dtype=jnp.float32) * 0.1
    w_out = jax.random.normal(k5, (E, E), dtype=jnp.float32) * 0.1

    packed = pack_mha_tri_weights(w_qkv, w_tqkv, w_out, H)  # one-time init-side packing
    out = mha_tri_pallas(x, tx, packed, H)
    out = jax.block_until_ready(out)

    ref = mha_tri_reference(x, tx, w_qkv, w_tqkv, w_out, H)
    assert out.shape == (B, Tt, E)
    # bf16 MXU operands + bf16 output (+ approx reciprocal) vs an exact f32 reference.
    assert jnp.allclose(out.astype(jnp.float32), ref, atol=5e-2, rtol=5e-2), \
        "mismatch vs reference"

    print("KERNEL_OK")
</pallas_src>

<mosaic_0001>
module attributes {stable_mosaic.version = 11 : i64} {
  func.func @_mha_tri_kernel(%arg0: i32, %arg1: i32, %arg2: memref<1x16x32xbf16, #tpu.memory_space<vmem>>, %arg3: memref<1x8x32xbf16, #tpu.memory_space<vmem>>, %arg4: memref<32x32xbf16, #tpu.memory_space<vmem>>, %arg5: memref<32x32xbf16, #tpu.memory_space<vmem>>, %arg6: memref<32x32xbf16, #tpu.memory_space<vmem>>, %arg7: memref<32x32xbf16, #tpu.memory_space<vmem>>, %arg8: memref<1x8x32xbf16, #tpu.memory_space<vmem>>, %arg9: memref<2x16x32xbf16, #tpu.memory_space<vmem>>) attributes {dimension_semantics = [#tpu.dimension_semantics<parallel>, #tpu.dimension_semantics<arbitrary>], iteration_bounds = array<i64: 2, 1>, scalar_prefetch = 0 : i64, scratch_operands = 1 : i64, tpu.core_type = #tpu.core_type<tc>, window_params = [{transform_indices = @transform_0, window_bounds = array<i64: 1, 16, 32>}, {transform_indices = @transform_1, window_bounds = array<i64: 1, 8, 32>}, {pipeline_mode = #tpu.pipeline_mode<synchronous>, transform_indices = @transform_2, window_bounds = array<i64: 32, 32>}, {pipeline_mode = #tpu.pipeline_mode<synchronous>, transform_indices = @transform_3, window_bounds = array<i64: 32, 32>}, {pipeline_mode = #tpu.pipeline_mode<synchronous>, transform_indices = @transform_4, window_bounds = array<i64: 32, 32>}, {pipeline_mode = #tpu.pipeline_mode<synchronous>, transform_indices = @transform_5, window_bounds = array<i64: 32, 32>}, {transform_indices = @transform_6, window_bounds = array<i64: 1, 8, 32>}]} {
    %c0_i32 = arith.constant 0 : i32
    %0 = arith.cmpi eq, %arg1, %c0_i32 : i32
    %1 = arith.extui %0 : i1 to i32
    %c0_i32_0 = arith.constant 0 : i32
    %2 = arith.cmpi ne, %1, %c0_i32_0 : i32
    scf.if %2 {
      %c0_32 = arith.constant 0 : index
      %c0_33 = arith.constant 0 : index
      %c0_34 = arith.constant 0 : index
      %87 = vector.load %arg2[%c0_32, %c0_33, %c0_34] : memref<1x16x32xbf16, #tpu.memory_space<vmem>>, vector<1x16x32xbf16>
      %88 = vector.shape_cast %87 : vector<1x16x32xbf16> to vector<16x32xbf16>
      %c0_35 = arith.constant 0 : index
      %c0_36 = arith.constant 0 : index
      %89 = vector.load %arg5[%c0_35, %c0_36] : memref<32x32xbf16, #tpu.memory_space<vmem>>, vector<32x32xbf16>
      %cst_37 = arith.constant dense<0.000000e+00> : vector<16x32xf32>
      %90 = tpu.matmul %88, %89, %cst_37 {dimension_numbers = #tpu.dot_dimension_numbers<[1], [0], [0], [1], [0, 0, 1, 1], [], []>} : vector<16x32xbf16>, vector<32x32xbf16>, vector<16x32xf32> -> vector<16x32xf32>
      %91 = arith.truncf %90 : vector<16x32xf32> to vector<16x32xbf16>
      %c0_38 = arith.constant 0 : index
      %c0_39 = arith.constant 0 : index
      %c0_40 = arith.constant 0 : index
      %92 = vector.load %arg9[%c0_38, %c0_39, %c0_40] : memref<2x16x32xbf16, #tpu.memory_space<vmem>>, vector<1x16x32xbf16>
      %93 = vector.shape_cast %92 : vector<1x16x32xbf16> to vector<16x32xbf16>
      %94 = vector.shape_cast %91 : vector<16x32xbf16> to vector<1x16x32xbf16>
      tpu.vector_store %arg9[%c0_38, %c0_39, %c0_40], %94 {strides = array<i32>} : memref<2x16x32xbf16, #tpu.memory_space<vmem>>, vector<1x16x32xbf16>,
      %c0_41 = arith.constant 0 : index
      %c0_42 = arith.constant 0 : index
      %95 = vector.load %arg6[%c0_41, %c0_42] : memref<32x32xbf16, #tpu.memory_space<vmem>>, vector<32x32xbf16>
      %cst_43 = arith.constant dense<0.000000e+00> : vector<16x32xf32>
      %96 = tpu.matmul %88, %95, %cst_43 {dimension_numbers = #tpu.dot_dimension_numbers<[1], [0], [0], [1], [0, 0, 1, 1], [], []>} : vector<16x32xbf16>, vector<32x32xbf16>, vector<16x32xf32> -> vector<16x32xf32>
      %97 = arith.truncf %96 : vector<16x32xf32> to vector<16x32xbf16>
      %c1_44 = arith.constant 1 : index
      %c0_45 = arith.constant 0 : index
      %c0_46 = arith.constant 0 : index
      %98 = vector.load %arg9[%c1_44, %c0_45, %c0_46] : memref<2x16x32xbf16, #tpu.memory_space<vmem>>, vector<1x16x32xbf16>
      %99 = vector.shape_cast %98 : vector<1x16x32xbf16> to vector<16x32xbf16>
      %100 = vector.shape_cast %97 : vector<16x32xbf16> to vector<1x16x32xbf16>
      tpu.vector_store %arg9[%c1_44, %c0_45, %c0_46], %100 {strides = array<i32>} : memref<2x16x32xbf16, #tpu.memory_space<vmem>>, vector<1x16x32xbf16>,
    } else {
    }
    %c0 = arith.constant 0 : index
    %c0_1 = arith.constant 0 : index
    %c0_2 = arith.constant 0 : index
    %3 = vector.load %arg3[%c0, %c0_1, %c0_2] : memref<1x8x32xbf16, #tpu.memory_space<vmem>>, vector<1x8x32xbf16>
    %4 = vector.shape_cast %3 : vector<1x8x32xbf16> to vector<8x32xbf16>
    %c0_3 = arith.constant 0 : index
    %c0_4 = arith.constant 0 : index
    %5 = vector.load %arg4[%c0_3, %c0_4] : memref<32x32xbf16, #tpu.memory_space<vmem>>, vector<32x32xbf16>
    %cst = arith.constant dense<0.000000e+00> : vector<8x32xf32>
    %6 = tpu.matmul %4, %5, %cst {dimension_numbers = #tpu.dot_dimension_numbers<[1], [0], [0], [1], [0, 0, 1, 1], [], []>} : vector<8x32xbf16>, vector<32x32xbf16>, vector<8x32xf32> -> vector<8x32xf32>
    %7 = arith.truncf %6 : vector<8x32xf32> to vector<8x32xbf16>
    %c0_5 = arith.constant 0 : index
    %c0_6 = arith.constant 0 : index
    %c0_7 = arith.constant 0 : index
    %8 = vector.load %arg9[%c0_5, %c0_6, %c0_7] : memref<2x16x32xbf16, #tpu.memory_space<vmem>>, vector<1x16x32xbf16>
    %9 = vector.shape_cast %8 : vector<1x16x32xbf16> to vector<16x32xbf16>
    %c1 = arith.constant 1 : index
    %c0_8 = arith.constant 0 : index
    %c0_9 = arith.constant 0 : index
    %10 = vector.load %arg9[%c1, %c0_8, %c0_9] : memref<2x16x32xbf16, #tpu.memory_space<vmem>>, vector<1x16x32xbf16>
    %11 = vector.shape_cast %10 : vector<1x16x32xbf16> to vector<16x32xbf16>
    %12 = vector.extract_strided_slice %7 {offsets = [0, 0], sizes = [8, 8], strides = [1, 1]} : vector<8x32xbf16> to vector<8x8xbf16>
    %13 = vector.extract_strided_slice %9 {offsets = [0, 0], sizes = [16, 8], strides = [1, 1]} : vector<16x32xbf16> to vector<16x8xbf16>
    %14 = vector.extract_strided_slice %11 {offsets = [0, 0], sizes = [16, 8], strides = [1, 1]} : vector<16x32xbf16> to vector<16x8xbf16>
    %cst_10 = arith.constant dense<0.000000e+00> : vector<8x16xf32>
    %15 = tpu.matmul %12, %13, %cst_10 {dimension_numbers = #tpu.dot_dimension_numbers<[1], [1], [0], [0], [0, 0, 1, 0], [], []>} : vector<8x8xbf16>, vector<16x8xbf16>, vector<8x16xf32> -> vector<8x16xf32>
    %cst_11 = arith.constant dense<0xFF800000> : vector<8xf32>
    %16 = vector.multi_reduction <maximumf>, %15, %cst_11 [1] : vector<8x16xf32> to vector<8xf32>
    %17 = vector.shape_cast %16 : vector<8xf32> to vector<8x1xf32>
    %18 = vector.broadcast %17 : vector<8x1xf32> to vector<8x16xf32>
    %19 = arith.subf %15, %18 : vector<8x16xf32>
    %20 = math.exp %19 : vector<8x16xf32>
    %cst_12 = arith.constant dense<0.000000e+00> : vector<8xf32>
    %21 = vector.multi_reduction <add>, %20, %cst_12 [1] : vector<8x16xf32> to vector<8xf32>
    %22 = vector.shape_cast %21 : vector<8xf32> to vector<8x1xf32>
    %23 = arith.truncf %20 : vector<8x16xf32> to vector<8x16xbf16>
    %cst_13 = arith.constant dense<0.000000e+00> : vector<8x8xf32>
    %24 = tpu.matmul %23, %14, %cst_13 {dimension_numbers = #tpu.dot_dimension_numbers<[1], [0], [0], [1], [0, 0, 1, 1], [], []>} : vector<8x16xbf16>, vector<16x8xbf16>, vector<8x8xf32> -> vector<8x8xf32>
    %25 = tpu.reciprocal %22 {approx = true} : vector<8x1xf32> -> vector<8x1xf32>
    %26 = vector.broadcast %25 : vector<8x1xf32> to vector<8x8xf32>
    %27 = arith.mulf %24, %26 : vector<8x8xf32>
    %28 = arith.truncf %27 : vector<8x8xf32> to vector<8x8xbf16>
    %29 = vector.extract_strided_slice %7 {offsets = [0, 8], sizes = [8, 8], strides = [1, 1]} : vector<8x32xbf16> to vector<8x8xbf16>
    %30 = vector.extract_strided_slice %9 {offsets = [0, 8], sizes = [16, 8], strides = [1, 1]} : vector<16x32xbf16> to vector<16x8xbf16>
    %31 = vector.extract_strided_slice %11 {offsets = [0, 8], sizes = [16, 8], strides = [1, 1]} : vector<16x32xbf16> to vector<16x8xbf16>
    %cst_14 = arith.constant dense<0.000000e+00> : vector<8x16xf32>
    %32 = tpu.matmul %29, %30, %cst_14 {dimension_numbers = #tpu.dot_dimension_numbers<[1], [1], [0], [0], [0, 0, 1, 0], [], []>} : vector<8x8xbf16>, vector<16x8xbf16>, vector<8x16xf32> -> vector<8x16xf32>
    %cst_15 = arith.constant dense<0xFF800000> : vector<8xf32>
    %33 = vector.multi_reduction <maximumf>, %32, %cst_15 [1] : vector<8x16xf32> to vector<8xf32>
    %34 = vector.shape_cast %33 : vector<8xf32> to vector<8x1xf32>
    %35 = vector.broadcast %34 : vector<8x1xf32> to vector<8x16xf32>
    %36 = arith.subf %32, %35 : vector<8x16xf32>
    %37 = math.exp %36 : vector<8x16xf32>
    %cst_16 = arith.constant dense<0.000000e+00> : vector<8xf32>
    %38 = vector.multi_reduction <add>, %37, %cst_16 [1] : vector<8x16xf32> to vector<8xf32>
    %39 = vector.shape_cast %38 : vector<8xf32> to vector<8x1xf32>
    %40 = arith.truncf %37 : vector<8x16xf32> to vector<8x16xbf16>
    %cst_17 = arith.constant dense<0.000000e+00> : vector<8x8xf32>
    %41 = tpu.matmul %40, %31, %cst_17 {dimension_numbers = #tpu.dot_dimension_numbers<[1], [0], [0], [1], [0, 0, 1, 1], [], []>} : vector<8x16xbf16>, vector<16x8xbf16>, vector<8x8xf32> -> vector<8x8xf32>
    %42 = tpu.reciprocal %39 {approx = true} : vector<8x1xf32> -> vector<8x1xf32>
    %43 = vector.broadcast %42 : vector<8x1xf32> to vector<8x8xf32>
    %44 = arith.mulf %41, %43 : vector<8x8xf32>
    %45 = arith.truncf %44 : vector<8x8xf32> to vector<8x8xbf16>
    %46 = vector.extract_strided_slice %7 {offsets = [0, 16], sizes = [8, 8], strides = [1, 1]} : vector<8x32xbf16> to vector<8x8xbf16>
    %47 = vector.extract_strided_slice %9 {offsets = [0, 16], sizes = [16, 8], strides = [1, 1]} : vector<16x32xbf16> to vector<16x8xbf16>
    %48 = vector.extract_strided_slice %11 {offsets = [0, 16], sizes = [16, 8], strides = [1, 1]} : vector<16x32xbf16> to vector<16x8xbf16>
    %cst_18 = arith.constant dense<0.000000e+00> : vector<8x16xf32>
    %49 = tpu.matmul %46, %47, %cst_18 {dimension_numbers = #tpu.dot_dimension_numbers<[1], [1], [0], [0], [0, 0, 1, 0], [], []>} : vector<8x8xbf16>, vector<16x8xbf16>, vector<8x16xf32> -> vector<8x16xf32>
    %cst_19 = arith.constant dense<0xFF800000> : vector<8xf32>
    %50 = vector.multi_reduction <maximumf>, %49, %cst_19 [1] : vector<8x16xf32> to vector<8xf32>
    %51 = vector.shape_cast %50 : vector<8xf32> to vector<8x1xf32>
    %52 = vector.broadcast %51 : vector<8x1xf32> to vector<8x16xf32>
    %53 = arith.subf %49, %52 : vector<8x16xf32>
    %54 = math.exp %53 : vector<8x16xf32>
    %cst_20 = arith.constant dense<0.000000e+00> : vector<8xf32>
    %55 = vector.multi_reduction <add>, %54, %cst_20 [1] : vector<8x16xf32> to vector<8xf32>
    %56 = vector.shape_cast %55 : vector<8xf32> to vector<8x1xf32>
    %57 = arith.truncf %54 : vector<8x16xf32> to vector<8x16xbf16>
    %cst_21 = arith.constant dense<0.000000e+00> : vector<8x8xf32>
    %58 = tpu.matmul %57, %48, %cst_21 {dimension_numbers = #tpu.dot_dimension_numbers<[1], [0], [0], [1], [0, 0, 1, 1], [], []>} : vector<8x16xbf16>, vector<16x8xbf16>, vector<8x8xf32> -> vector<8x8xf32>
    %59 = tpu.reciprocal %56 {approx = true} : vector<8x1xf32> -> vector<8x1xf32>
    %60 = vector.broadcast %59 : vector<8x1xf32> to vector<8x8xf32>
    %61 = arith.mulf %58, %60 : vector<8x8xf32>
    %62 = arith.truncf %61 : vector<8x8xf32> to vector<8x8xbf16>
    %63 = vector.extract_strided_slice %7 {offsets = [0, 24], sizes = [8, 8], strides = [1, 1]} : vector<8x32xbf16> to vector<8x8xbf16>
    %64 = vector.extract_strided_slice %9 {offsets = [0, 24], sizes = [16, 8], strides = [1, 1]} : vector<16x32xbf16> to vector<16x8xbf16>
    %65 = vector.extract_strided_slice %11 {offsets = [0, 24], sizes = [16, 8], strides = [1, 1]} : vector<16x32xbf16> to vector<16x8xbf16>
    %cst_22 = arith.constant dense<0.000000e+00> : vector<8x16xf32>
    %66 = tpu.matmul %63, %64, %cst_22 {dimension_numbers = #tpu.dot_dimension_numbers<[1], [1], [0], [0], [0, 0, 1, 0], [], []>} : vector<8x8xbf16>, vector<16x8xbf16>, vector<8x16xf32> -> vector<8x16xf32>
    %cst_23 = arith.constant dense<0xFF800000> : vector<8xf32>
    %67 = vector.multi_reduction <maximumf>, %66, %cst_23 [1] : vector<8x16xf32> to vector<8xf32>
    %68 = vector.shape_cast %67 : vector<8xf32> to vector<8x1xf32>
    %69 = vector.broadcast %68 : vector<8x1xf32> to vector<8x16xf32>
    %70 = arith.subf %66, %69 : vector<8x16xf32>
    %71 = math.exp %70 : vector<8x16xf32>
    %cst_24 = arith.constant dense<0.000000e+00> : vector<8xf32>
    %72 = vector.multi_reduction <add>, %71, %cst_24 [1] : vector<8x16xf32> to vector<8xf32>
    %73 = vector.shape_cast %72 : vector<8xf32> to vector<8x1xf32>
    %74 = arith.truncf %71 : vector<8x16xf32> to vector<8x16xbf16>
    %cst_25 = arith.constant dense<0.000000e+00> : vector<8x8xf32>
    %75 = tpu.matmul %74, %65, %cst_25 {dimension_numbers = #tpu.dot_dimension_numbers<[1], [0], [0], [1], [0, 0, 1, 1], [], []>} : vector<8x16xbf16>, vector<16x8xbf16>, vector<8x8xf32> -> vector<8x8xf32>
    %76 = tpu.reciprocal %73 {approx = true} : vector<8x1xf32> -> vector<8x1xf32>
    %77 = vector.broadcast %76 : vector<8x1xf32> to vector<8x8xf32>
    %78 = arith.mulf %75, %77 : vector<8x8xf32>
    %79 = arith.truncf %78 : vector<8x8xf32> to vector<8x8xbf16>
    %80 = tpu.concatenate %28, %45, %62, %79 in 1 : vector<8x8xbf16>, vector<8x8xbf16>, vector<8x8xbf16>, vector<8x8xbf16> -> vector<8x32xbf16>
    %c0_26 = arith.constant 0 : index
    %c0_27 = arith.constant 0 : index
    %81 = vector.load %arg7[%c0_26, %c0_27] : memref<32x32xbf16, #tpu.memory_space<vmem>>, vector<32x32xbf16>
    %cst_28 = arith.constant dense<0.000000e+00> : vector<8x32xf32>
    %82 = tpu.matmul %80, %81, %cst_28 {dimension_numbers = #tpu.dot_dimension_numbers<[1], [0], [0], [1], [0, 0, 1, 1], [], []>} : vector<8x32xbf16>, vector<32x32xbf16>, vector<8x32xf32> -> vector<8x32xf32>
    %83 = arith.truncf %82 : vector<8x32xf32> to vector<8x32xbf16>
    %c0_29 = arith.constant 0 : index
    %c0_30 = arith.constant 0 : index
    %c0_31 = arith.constant 0 : index
    %84 = vector.load %arg8[%c0_29, %c0_30, %c0_31] : memref<1x8x32xbf16, #tpu.memory_space<vmem>>, vector<1x8x32xbf16>
    %85 = vector.shape_cast %84 : vector<1x8x32xbf16> to vector<8x32xbf16>
    %86 = vector.shape_cast %83 : vector<8x32xbf16> to vector<1x8x32xbf16>
    tpu.vector_store %arg8[%c0_29, %c0_30, %c0_31], %86 {strides = array<i32>} : memref<1x8x32xbf16, #tpu.memory_space<vmem>>, vector<1x8x32xbf16>,
    return
  }
  func.func @transform_0(%arg0: i32, %arg1: i32) -> (i32, i32, i32) {
    %c0_i32 = arith.constant 0 : i32
    %c0_i32_0 = arith.constant 0 : i32
    %c0_i32_1 = arith.constant 0 : i32
    return %arg0, %c0_i32, %c0_i32_0 : i32, i32, i32
  }
  func.func @transform_1(%arg0: i32, %arg1: i32) -> (i32, i32, i32) {
    %c0_i32 = arith.constant 0 : i32
    %c0_i32_0 = arith.constant 0 : i32
    return %arg0, %arg1, %c0_i32 : i32, i32, i32
  }
  func.func @transform_2(%arg0: i32, %arg1: i32) -> (i32, i32) {
    %c0_i32 = arith.constant 0 : i32
    %c0_i32_0 = arith.constant 0 : i32
    %c0_i32_1 = arith.constant 0 : i32
    return %c0_i32, %c0_i32_0 : i32, i32
  }
  func.func @transform_3(%arg0: i32, %arg1: i32) -> (i32, i32) {
    %c0_i32 = arith.constant 0 : i32
    %c0_i32_0 = arith.constant 0 : i32
    %c0_i32_1 = arith.constant 0 : i32
    return %c0_i32, %c0_i32_0 : i32, i32
  }
  func.func @transform_4(%arg0: i32, %arg1: i32) -> (i32, i32) {
    %c0_i32 = arith.constant 0 : i32
    %c0_i32_0 = arith.constant 0 : i32
    %c0_i32_1 = arith.constant 0 : i32
    return %c0_i32, %c0_i32_0 : i32, i32
  }
  func.func @transform_5(%arg0: i32, %arg1: i32) -> (i32, i32) {
    %c0_i32 = arith.constant 0 : i32
    %c0_i32_0 = arith.constant 0 : i32
    %c0_i32_1 = arith.constant 0 : i32
    return %c0_i32, %c0_i32_0 : i32, i32
  }
  func.func @transform_6(%arg0: i32, %arg1: i32) -> (i32, i32, i32) {
    %c0_i32 = arith.constant 0 : i32
    %c0_i32_0 = arith.constant 0 : i32
    return %arg0, %arg1, %c0_i32 : i32, i32, i32
  }
}

module attributes {stable_mosaic.version = 11 : i64} {
  func.func @_mha_tri_kernel(%arg0: i32, %arg1: i32, %arg2: memref<1x16x32xbf16, #tpu.memory_space<vmem>>, %arg3: memref<1x8x32xbf16, #tpu.memory_space<vmem>>, %arg4: memref<32x32xbf16, #tpu.memory_space<vmem>>, %arg5: memref<32x32xbf16, #tpu.memory_space<vmem>>, %arg6: memref<32x32xbf16, #tpu.memory_space<vmem>>, %arg7: memref<32x32xbf16, #tpu.memory_space<vmem>>, %arg8: memref<1x8x32xbf16, #tpu.memory_space<vmem>>, %arg9: memref<2x16x32xbf16, #tpu.memory_space<vmem>>) attributes {dimension_semantics = [#tpu.dimension_semantics<parallel>, #tpu.dimension_semantics<arbitrary>], iteration_bounds = array<i64: 2, 1>, scalar_prefetch = 0 : i64, scratch_operands = 1 : i64, tpu.core_type = #tpu.core_type<tc>, window_params = [{transform_indices = @transform_0, window_bounds = array<i64: 1, 16, 32>}, {transform_indices = @transform_1, window_bounds = array<i64: 1, 8, 32>}, {pipeline_mode = #tpu.pipeline_mode<synchronous>, transform_indices = @transform_2, window_bounds = array<i64: 32, 32>}, {pipeline_mode = #tpu.pipeline_mode<synchronous>, transform_indices = @transform_3, window_bounds = array<i64: 32, 32>}, {pipeline_mode = #tpu.pipeline_mode<synchronous>, transform_indices = @transform_4, window_bounds = array<i64: 32, 32>}, {pipeline_mode = #tpu.pipeline_mode<synchronous>, transform_indices = @transform_5, window_bounds = array<i64: 32, 32>}, {transform_indices = @transform_6, window_bounds = array<i64: 1, 8, 32>}]} {
    %c0_i32 = arith.constant 0 : i32
    %0 = arith.cmpi eq, %arg1, %c0_i32 : i32
    %1 = arith.extui %0 : i1 to i32
    %c0_i32_0 = arith.constant 0 : i32
    %2 = arith.cmpi ne, %1, %c0_i32_0 : i32
    scf.if %2 {
      %c0_32 = arith.constant 0 : index
      %c0_33 = arith.constant 0 : index
      %c0_34 = arith.constant 0 : index
      %87 = vector.load %arg2[%c0_32, %c0_33, %c0_34] : memref<1x16x32xbf16, #tpu.memory_space<vmem>>, vector<1x16x32xbf16>
      %88 = vector.shape_cast %87 : vector<1x16x32xbf16> to vector<16x32xbf16>
      %c0_35 = arith.constant 0 : index
      %c0_36 = arith.constant 0 : index
      %89 = vector.load %arg5[%c0_35, %c0_36] : memref<32x32xbf16, #tpu.memory_space<vmem>>, vector<32x32xbf16>
      %cst_37 = arith.constant dense<0.000000e+00> : vector<16x32xf32>
      %90 = tpu.matmul %88, %89, %cst_37 {dimension_numbers = #tpu.dot_dimension_numbers<[1], [0], [0], [1], [0, 0, 1, 1], [], []>} : vector<16x32xbf16>, vector<32x32xbf16>, vector<16x32xf32> -> vector<16x32xf32>
      %91 = arith.truncf %90 : vector<16x32xf32> to vector<16x32xbf16>
      %c0_38 = arith.constant 0 : index
      %c0_39 = arith.constant 0 : index
      %c0_40 = arith.constant 0 : index
      %92 = vector.load %arg9[%c0_38, %c0_39, %c0_40] : memref<2x16x32xbf16, #tpu.memory_space<vmem>>, vector<1x16x32xbf16>
      %93 = vector.shape_cast %92 : vector<1x16x32xbf16> to vector<16x32xbf16>
      %94 = vector.shape_cast %91 : vector<16x32xbf16> to vector<1x16x32xbf16>
      tpu.vector_store %arg9[%c0_38, %c0_39, %c0_40], %94 {strides = array<i32>} : memref<2x16x32xbf16, #tpu.memory_space<vmem>>, vector<1x16x32xbf16>,
      %c0_41 = arith.constant 0 : index
      %c0_42 = arith.constant 0 : index
      %95 = vector.load %arg6[%c0_41, %c0_42] : memref<32x32xbf16, #tpu.memory_space<vmem>>, vector<32x32xbf16>
      %cst_43 = arith.constant dense<0.000000e+00> : vector<16x32xf32>
      %96 = tpu.matmul %88, %95, %cst_43 {dimension_numbers = #tpu.dot_dimension_numbers<[1], [0], [0], [1], [0, 0, 1, 1], [], []>} : vector<16x32xbf16>, vector<32x32xbf16>, vector<16x32xf32> -> vector<16x32xf32>
      %97 = arith.truncf %96 : vector<16x32xf32> to vector<16x32xbf16>
      %c1_44 = arith.constant 1 : index
      %c0_45 = arith.constant 0 : index
      %c0_46 = arith.constant 0 : index
      %98 = vector.load %arg9[%c1_44, %c0_45, %c0_46] : memref<2x16x32xbf16, #tpu.memory_space<vmem>>, vector<1x16x32xbf16>
      %99 = vector.shape_cast %98 : vector<1x16x32xbf16> to vector<16x32xbf16>
      %100 = vector.shape_cast %97 : vector<16x32xbf16> to vector<1x16x32xbf16>
      tpu.vector_store %arg9[%c1_44, %c0_45, %c0_46], %100 {strides = array<i32>} : memref<2x16x32xbf16, #tpu.memory_space<vmem>>, vector<1x16x32xbf16>,
    } else {
    }
    %c0 = arith.constant 0 : index
    %c0_1 = arith.constant 0 : index
    %c0_2 = arith.constant 0 : index
    %3 = vector.load %arg3[%c0, %c0_1, %c0_2] : memref<1x8x32xbf16, #tpu.memory_space<vmem>>, vector<1x8x32xbf16>
    %4 = vector.shape_cast %3 : vector<1x8x32xbf16> to vector<8x32xbf16>
    %c0_3 = arith.constant 0 : index
    %c0_4 = arith.constant 0 : index
    %5 = vector.load %arg4[%c0_3, %c0_4] : memref<32x32xbf16, #tpu.memory_space<vmem>>, vector<32x32xbf16>
    %cst = arith.constant dense<0.000000e+00> : vector<8x32xf32>
    %6 = tpu.matmul %4, %5, %cst {dimension_numbers = #tpu.dot_dimension_numbers<[1], [0], [0], [1], [0, 0, 1, 1], [], []>} : vector<8x32xbf16>, vector<32x32xbf16>, vector<8x32xf32> -> vector<8x32xf32>
    %7 = arith.truncf %6 : vector<8x32xf32> to vector<8x32xbf16>
    %c0_5 = arith.constant 0 : index
    %c0_6 = arith.constant 0 : index
    %c0_7 = arith.constant 0 : index
    %8 = vector.load %arg9[%c0_5, %c0_6, %c0_7] : memref<2x16x32xbf16, #tpu.memory_space<vmem>>, vector<1x16x32xbf16>
    %9 = vector.shape_cast %8 : vector<1x16x32xbf16> to vector<16x32xbf16>
    %c1 = arith.constant 1 : index
    %c0_8 = arith.constant 0 : index
    %c0_9 = arith.constant 0 : index
    %10 = vector.load %arg9[%c1, %c0_8, %c0_9] : memref<2x16x32xbf16, #tpu.memory_space<vmem>>, vector<1x16x32xbf16>
    %11 = vector.shape_cast %10 : vector<1x16x32xbf16> to vector<16x32xbf16>
    %12 = vector.extract_strided_slice %7 {offsets = [0, 0], sizes = [8, 8], strides = [1, 1]} : vector<8x32xbf16> to vector<8x8xbf16>
    %13 = vector.extract_strided_slice %9 {offsets = [0, 0], sizes = [16, 8], strides = [1, 1]} : vector<16x32xbf16> to vector<16x8xbf16>
    %14 = vector.extract_strided_slice %11 {offsets = [0, 0], sizes = [16, 8], strides = [1, 1]} : vector<16x32xbf16> to vector<16x8xbf16>
    %cst_10 = arith.constant dense<0.000000e+00> : vector<8x16xf32>
    %15 = tpu.matmul %12, %13, %cst_10 {dimension_numbers = #tpu.dot_dimension_numbers<[1], [1], [0], [0], [0, 0, 1, 0], [], []>} : vector<8x8xbf16>, vector<16x8xbf16>, vector<8x16xf32> -> vector<8x16xf32>
    %cst_11 = arith.constant dense<0xFF800000> : vector<8xf32>
    %16 = vector.multi_reduction <maximumf>, %15, %cst_11 [1] : vector<8x16xf32> to vector<8xf32>
    %17 = vector.shape_cast %16 : vector<8xf32> to vector<8x1xf32>
    %18 = vector.broadcast %17 : vector<8x1xf32> to vector<8x16xf32>
    %19 = arith.subf %15, %18 : vector<8x16xf32>
    %20 = math.exp %19 : vector<8x16xf32>
    %cst_12 = arith.constant dense<0.000000e+00> : vector<8xf32>
    %21 = vector.multi_reduction <add>, %20, %cst_12 [1] : vector<8x16xf32> to vector<8xf32>
    %22 = vector.shape_cast %21 : vector<8xf32> to vector<8x1xf32>
    %23 = arith.truncf %20 : vector<8x16xf32> to vector<8x16xbf16>
    %cst_13 = arith.constant dense<0.000000e+00> : vector<8x8xf32>
    %24 = tpu.matmul %23, %14, %cst_13 {dimension_numbers = #tpu.dot_dimension_numbers<[1], [0], [0], [1], [0, 0, 1, 1], [], []>} : vector<8x16xbf16>, vector<16x8xbf16>, vector<8x8xf32> -> vector<8x8xf32>
    %25 = tpu.reciprocal %22 {approx = true} : vector<8x1xf32> -> vector<8x1xf32>
    %26 = vector.broadcast %25 : vector<8x1xf32> to vector<8x8xf32>
    %27 = arith.mulf %24, %26 : vector<8x8xf32>
    %28 = arith.truncf %27 : vector<8x8xf32> to vector<8x8xbf16>
    %29 = vector.extract_strided_slice %7 {offsets = [0, 8], sizes = [8, 8], strides = [1, 1]} : vector<8x32xbf16> to vector<8x8xbf16>
    %30 = vector.extract_strided_slice %9 {offsets = [0, 8], sizes = [16, 8], strides = [1, 1]} : vector<16x32xbf16> to vector<16x8xbf16>
    %31 = vector.extract_strided_slice %11 {offsets = [0, 8], sizes = [16, 8], strides = [1, 1]} : vector<16x32xbf16> to vector<16x8xbf16>
    %cst_14 = arith.constant dense<0.000000e+00> : vector<8x16xf32>
    %32 = tpu.matmul %29, %30, %cst_14 {dimension_numbers = #tpu.dot_dimension_numbers<[1], [1], [0], [0], [0, 0, 1, 0], [], []>} : vector<8x8xbf16>, vector<16x8xbf16>, vector<8x16xf32> -> vector<8x16xf32>
    %cst_15 = arith.constant dense<0xFF800000> : vector<8xf32>
    %33 = vector.multi_reduction <maximumf>, %32, %cst_15 [1] : vector<8x16xf32> to vector<8xf32>
    %34 = vector.shape_cast %33 : vector<8xf32> to vector<8x1xf32>
    %35 = vector.broadcast %34 : vector<8x1xf32> to vector<8x16xf32>
    %36 = arith.subf %32, %35 : vector<8x16xf32>
    %37 = math.exp %36 : vector<8x16xf32>
    %cst_16 = arith.constant dense<0.000000e+00> : vector<8xf32>
    %38 = vector.multi_reduction <add>, %37, %cst_16 [1] : vector<8x16xf32> to vector<8xf32>
    %39 = vector.shape_cast %38 : vector<8xf32> to vector<8x1xf32>
    %40 = arith.truncf %37 : vector<8x16xf32> to vector<8x16xbf16>
    %cst_17 = arith.constant dense<0.000000e+00> : vector<8x8xf32>
    %41 = tpu.matmul %40, %31, %cst_17 {dimension_numbers = #tpu.dot_dimension_numbers<[1], [0], [0], [1], [0, 0, 1, 1], [], []>} : vector<8x16xbf16>, vector<16x8xbf16>, vector<8x8xf32> -> vector<8x8xf32>
    %42 = tpu.reciprocal %39 {approx = true} : vector<8x1xf32> -> vector<8x1xf32>
    %43 = vector.broadcast %42 : vector<8x1xf32> to vector<8x8xf32>
    %44 = arith.mulf %41, %43 : vector<8x8xf32>
    %45 = arith.truncf %44 : vector<8x8xf32> to vector<8x8xbf16>
    %46 = vector.extract_strided_slice %7 {offsets = [0, 16], sizes = [8, 8], strides = [1, 1]} : vector<8x32xbf16> to vector<8x8xbf16>
    %47 = vector.extract_strided_slice %9 {offsets = [0, 16], sizes = [16, 8], strides = [1, 1]} : vector<16x32xbf16> to vector<16x8xbf16>
    %48 = vector.extract_strided_slice %11 {offsets = [0, 16], sizes = [16, 8], strides = [1, 1]} : vector<16x32xbf16> to vector<16x8xbf16>
    %cst_18 = arith.constant dense<0.000000e+00> : vector<8x16xf32>
    %49 = tpu.matmul %46, %47, %cst_18 {dimension_numbers = #tpu.dot_dimension_numbers<[1], [1], [0], [0], [0, 0, 1, 0], [], []>} : vector<8x8xbf16>, vector<16x8xbf16>, vector<8x16xf32> -> vector<8x16xf32>
    %cst_19 = arith.constant dense<0xFF800000> : vector<8xf32>
    %50 = vector.multi_reduction <maximumf>, %49, %cst_19 [1] : vector<8x16xf32> to vector<8xf32>
    %51 = vector.shape_cast %50 : vector<8xf32> to vector<8x1xf32>
    %52 = vector.broadcast %51 : vector<8x1xf32> to vector<8x16xf32>
    %53 = arith.subf %49, %52 : vector<8x16xf32>
    %54 = math.exp %53 : vector<8x16xf32>
    %cst_20 = arith.constant dense<0.000000e+00> : vector<8xf32>
    %55 = vector.multi_reduction <add>, %54, %cst_20 [1] : vector<8x16xf32> to vector<8xf32>
    %56 = vector.shape_cast %55 : vector<8xf32> to vector<8x1xf32>
    %57 = arith.truncf %54 : vector<8x16xf32> to vector<8x16xbf16>
    %cst_21 = arith.constant dense<0.000000e+00> : vector<8x8xf32>
    %58 = tpu.matmul %57, %48, %cst_21 {dimension_numbers = #tpu.dot_dimension_numbers<[1], [0], [0], [1], [0, 0, 1, 1], [], []>} : vector<8x16xbf16>, vector<16x8xbf16>, vector<8x8xf32> -> vector<8x8xf32>
    %59 = tpu.reciprocal %56 {approx = true} : vector<8x1xf32> -> vector<8x1xf32>
    %60 = vector.broadcast %59 : vector<8x1xf32> to vector<8x8xf32>
    %61 = arith.mulf %58, %60 : vector<8x8xf32>
    %62 = arith.truncf %61 : vector<8x8xf32> to vector<8x8xbf16>
    %63 = vector.extract_strided_slice %7 {offsets = [0, 24], sizes = [8, 8], strides = [1, 1]} : vector<8x32xbf16> to vector<8x8xbf16>
    %64 = vector.extract_strided_slice %9 {offsets = [0, 24], sizes = [16, 8], strides = [1, 1]} : vector<16x32xbf16> to vector<16x8xbf16>
    %65 = vector.extract_strided_slice %11 {offsets = [0, 24], sizes = [16, 8], strides = [1, 1]} : vector<16x32xbf16> to vector<16x8xbf16>
    %cst_22 = arith.constant dense<0.000000e+00> : vector<8x16xf32>
    %66 = tpu.matmul %63, %64, %cst_22 {dimension_numbers = #tpu.dot_dimension_numbers<[1], [1], [0], [0], [0, 0, 1, 0], [], []>} : vector<8x8xbf16>, vector<16x8xbf16>, vector<8x16xf32> -> vector<8x16xf32>
    %cst_23 = arith.constant dense<0xFF800000> : vector<8xf32>
    %67 = vector.multi_reduction <maximumf>, %66, %cst_23 [1] : vector<8x16xf32> to vector<8xf32>
    %68 = vector.shape_cast %67 : vector<8xf32> to vector<8x1xf32>
    %69 = vector.broadcast %68 : vector<8x1xf32> to vector<8x16xf32>
    %70 = arith.subf %66, %69 : vector<8x16xf32>
    %71 = math.exp %70 : vector<8x16xf32>
    %cst_24 = arith.constant dense<0.000000e+00> : vector<8xf32>
    %72 = vector.multi_reduction <add>, %71, %cst_24 [1] : vector<8x16xf32> to vector<8xf32>
    %73 = vector.shape_cast %72 : vector<8xf32> to vector<8x1xf32>
    %74 = arith.truncf %71 : vector<8x16xf32> to vector<8x16xbf16>
    %cst_25 = arith.constant dense<0.000000e+00> : vector<8x8xf32>
    %75 = tpu.matmul %74, %65, %cst_25 {dimension_numbers = #tpu.dot_dimension_numbers<[1], [0], [0], [1], [0, 0, 1, 1], [], []>} : vector<8x16xbf16>, vector<16x8xbf16>, vector<8x8xf32> -> vector<8x8xf32>
    %76 = tpu.reciprocal %73 {approx = true} : vector<8x1xf32> -> vector<8x1xf32>
    %77 = vector.broadcast %76 : vector<8x1xf32> to vector<8x8xf32>
    %78 = arith.mulf %75, %77 : vector<8x8xf32>
    %79 = arith.truncf %78 : vector<8x8xf32> to vector<8x8xbf16>
    %80 = tpu.concatenate %28, %45, %62, %79 in 1 : vector<8x8xbf16>, vector<8x8xbf16>, vector<8x8xbf16>, vector<8x8xbf16> -> vector<8x32xbf16>
    %c0_26 = arith.constant 0 : index
    %c0_27 = arith.constant 0 : index
    %81 = vector.load %arg7[%c0_26, %c0_27] : memref<32x32xbf16, #tpu.memory_space<vmem>>, vector<32x32xbf16>
    %cst_28 = arith.constant dense<0.000000e+00> : vector<8x32xf32>
    %82 = tpu.matmul %80, %81, %cst_28 {dimension_numbers = #tpu.dot_dimension_numbers<[1], [0], [0], [1], [0, 0, 1, 1], [], []>} : vector<8x32xbf16>, vector<32x32xbf16>, vector<8x32xf32> -> vector<8x32xf32>
    %83 = arith.truncf %82 : vector<8x32xf32> to vector<8x32xbf16>
    %c0_29 = arith.constant 0 : index
    %c0_30 = arith.constant 0 : index
    %c0_31 = arith.constant 0 : index
    %84 = vector.load %arg8[%c0_29, %c0_30, %c0_31] : memref<1x8x32xbf16, #tpu.memory_space<vmem>>, vector<1x8x32xbf16>
    %85 = vector.shape_cast %84 : vector<1x8x32xbf16> to vector<8x32xbf16>
    %86 = vector.shape_cast %83 : vector<8x32xbf16> to vector<1x8x32xbf16>
    tpu.vector_store %arg8[%c0_29, %c0_30, %c0_31], %86 {strides = array<i32>} : memref<1x8x32xbf16, #tpu.memory_space<vmem>>, vector<1x8x32xbf16>,
    return
  }
  func.func @transform_0(%arg0: i32, %arg1: i32) -> (i32, i32, i32) {
    %c0_i32 = arith.constant 0 : i32
    %c0_i32_0 = arith.constant 0 : i32
    %c0_i32_1 = arith.constant 0 : i32
    return %arg0, %c0_i32, %c0_i32_0 : i32, i32, i32
  }
  func.func @transform_1(%arg0: i32, %arg1: i32) -> (i32, i32, i32) {
    %c0_i32 = arith.constant 0 : i32
    %c0_i32_0 = arith.constant 0 : i32
    return %arg0, %arg1, %c0_i32 : i32, i32, i32
  }
  func.func @transform_2(%arg0: i32, %arg1: i32) -> (i32, i32) {
    %c0_i32 = arith.constant 0 : i32
    %c0_i32_0 = arith.constant 0 : i32
    %c0_i32_1 = arith.constant 0 : i32
    return %c0_i32, %c0_i32_0 : i32, i32
  }
  func.func @transform_3(%arg0: i32, %arg1: i32) -> (i32, i32) {
    %c0_i32 = arith.constant 0 : i32
    %c0_i32_0 = arith.constant 0 : i32
    %c0_i32_1 = arith.constant 0 : i32
    return %c0_i32, %c0_i32_0 : i32, i32
  }
  func.func @transform_4(%arg0: i32, %arg1: i32) -> (i32, i32) {
    %c0_i32 = arith.constant 0 : i32
    %c0_i32_0 = arith.constant 0 : i32
    %c0_i32_1 = arith.constant 0 : i32
    return %c0_i32, %c0_i32_0 : i32, i32
  }
  func.func @transform_5(%arg0: i32, %arg1: i32) -> (i32, i32) {
    %c0_i32 = arith.constant 0 : i32
    %c0_i32_0 = arith.constant 0 : i32
    %c0_i32_1 = arith.constant 0 : i32
    return %c0_i32, %c0_i32_0 : i32, i32
  }
  func.func @transform_6(%arg0: i32, %arg1: i32) -> (i32, i32, i32) {
    %c0_i32 = arith.constant 0 : i32
    %c0_i32_0 = arith.constant 0 : i32
    return %arg0, %arg1, %c0_i32 : i32, i32, i32
  }
}

</mosaic_0001>

<bundles_post_ra>
// kernel: tpu_custom_call.1
= control target key start
LH: loop header
LB: loop body
LE: loop exit
PB: predicated region body
PF: predicated region fallthrough
CT: control target
= control target key end

     0   :  { %s2215_s0 = inlined_call_operand.hbm [shape: bf16[2,16,32], index: 0, kind: input, shape index: {}]   ;;  %s2216_s1 = inlined_call_operand.hbm [shape: bf16[2,8,32], index: 1, kind: input, shape index: {}]   ;;  %s2217_s2 = inlined_call_operand.hbm [shape: bf16[32,32], index: 2, kind: input, shape index: {}]   ;;  %s2218_s3 = inlined_call_operand.hbm [shape: bf16[32,32], index: 3, kind: input, shape index: {}]   ;;  %s2219_s4 = inlined_call_operand.hbm [shape: bf16[32,32], index: 4, kind: input, shape index: {}]   ;;  %s2220_s5 = inlined_call_operand.vmem [shape: bf16[32,32], index: 5, kind: input, shape index: {}]   ;;  %s2221_s6 = inlined_call_operand.hbm [shape: bf16[2,8,32], index: 6, kind: output, shape index: {}]  }
   0x1   :  { %2230 = sst [smem:[#allocation20_spill]] %s2215_s0 }
   0x2   :  { %2231 = sst [smem:[#allocation21_spill]] %s2217_s2 }
   0x3   :  { %2232 = sst [smem:[#allocation22_spill]] %s2218_s3 }
   0x4   :  { %2233 = sst [smem:[#allocation23_spill]] %s2219_s4 }
   0x5   :  { %11 = vsyncpa [#allocation4], 0 }
   0x6   :  { %13 = vsyncpa [#allocation4 + $0x1], 0 }
   0x7   :  { %14 = vsyncpa [#allocation7], 0 }
   0x8   :  { %16 = vsyncpa [#allocation7 + $0x1], 0 }
   0x9   :  { %17 = vsyncpa [#allocation10], 0 }
   0xa   :  { %18 = vsyncpa [#allocation5], 0 }
   0xb   :  { %20 = vsyncpa [#allocation5 + $0x1], 0  ;;  %s1802_s21 = smov 0   ;;  %s1804_s22 = smov 0  }
   0xc   :  { %s1806_s23 = smov 0   ;;  %s1808_s24 = smov 0  }
   0xd   :  { %s1810_s25 = smov 0   ;;  %s1812_s26 = smov 0  }
   0xe LB: > { %2234 = sst [smem:[#allocation18_spill]] %s1729_s21  ;;  %s1833_s27 = sadd.s32 4294967295, %s1749_s26   ;;  %s1749_s26 = sphi %s1812_s26, %s26_s26   ;;  %s1745_s25 = sphi %s1810_s25, %s2266_s25   ;;  %s1741_s24 = sphi %s1808_s24, %s2265_s24   ;;  %s1737_s23 = sphi %s1806_s23, %s2264_s23   ;;  %s1733_s22 = sphi %s1804_s22, %s2263_s22   ;;  %s1729_s21 = sphi %s1802_s21, %s2262_s21  }
   0xf   : > { %s1226_s28 = sadd.s32 4294967294, %s1749_s26   ;;  %p58_p0 = scmp.ne.s32.totalorder %s1733_s22, %s1729_s21 }
  0x10   : > { %p2222_p1 = scmp.eq.s32.totalorder %s1833_s27, 0  ;;  %p202_p3 = scmp.eq.s32.totalorder %s1226_s28, 1 }
  0x11   : > { %p1227_p5 = scmp.ge.s32.totalorder %s1749_s26, 1  ;;  %p209_p7 = scmp.lt.s32.totalorder %s1749_s26, 3 }
  0x12   : > { %p1842_p4 = por %p2222_p1, %p58_p0  ;;  %p1847_p6 = por %p202_p3, %p58_p0 }
  0x13   : > { %p1852_p8 = pnand %p1227_p5, %p209_p7  ;;  %s1751_s8 = smov [#allocation8]  }
  0x14   : > { %s2235_s29 = scalar_select %p1842_p4, 1, 0 }
  0x15   : > { %s2236_s30 = scalar_select %p1847_p6, 1, 0 }
  0x16   : > { %s2238_s7 = scalar_select %p1852_p8, 1, 0 }
  0x17   : > { %2237 = sst [smem:[#allocation19_spill]] %s2236_s30  ;;  %s221_s9 = sshll.u32 %s1751_s8, 4  ;;  %s1856_s9 = int_to_ptr.vmem [resolvable:$true] %s221_s9 }
  0x18   : > { %p1396_p9 = pneg %p1852_p8  ;;  %s1752_s11 = smov [#allocation9]  }
  0x19   : > { %s234_s12 = sshll.u32 %s1752_s11, 4  ;;  %s1753_s13 = smov [#allocation11]   ;;  %s1867_s12 = int_to_ptr.vmem [resolvable:$true] %s234_s12 }
  0x1a   : > { %p1863_p11 = pnand %p1396_p9, %p2222_p1  ;;  %s1869_s14 = sshll.u32 %s1753_s13, 4  ;;  %s248_s14 = int_to_ptr.vmem [resolvable:$true] %s1869_s14 }
  0x1b   : > { %s2240_s2 = sld [smem:[#allocation21_spill]] }
  0x1c   : > { %p1879_p13 = pneg %p1863_p11 }
  0x21   : > { %s1511_s17 = scalar_lea.hbm %s2240_s2, 256 }
  0x22   : > { %p1512_p12 = scmp.ne.s32.totalorder %s2240_s2, %s1511_s17  ;;  %p1518_p5 = scmp.lt.u32.totalorder %s1511_s17, %s2240_s2 }
  0x24   : > { %p1514_p0 = pnand %p1879_p13, %p1512_p12 }
  0x26   : > { %p1515_p3 = pneg %p1514_p0 }
  0x28   : > { %p1520_p7 = pnand %p1518_p5, %p1515_p3 }
  0x2a   : > { %1523 = shalt.err (!%p1520_p7)
}
  0x2b   : > { %s1524_s11 = scalar_lea.vmem %s1856_s9, 256  ;;  %p1532_p2 = scmp.lt.s32.totalorder %s1856_s9, %s1856_s9 }
  0x2c   : > { %p1525_p9 = scmp.ne.s32.totalorder %s1856_s9, %s1524_s11  ;;  %p1533_p6 = scmp.lt.s32.totalorder %s1524_s11, %s1524_s11 }
  0x2e   : > { %p1527_p10 = pnand %p1525_p9, %p1879_p13  ;;  %p1534_p12 = por %p1533_p6, %p1532_p2 }
  0x30   : > { %p1528_p1 = pneg %p1527_p10 }
  0x32   : > { %p1535_p0 = pnand %p1534_p12, %p1528_p1 }
  0x34   : > { %1538 = shalt.err (!%p1535_p0)
}
  0x35   : > { %s2227_s13 = smov 64   ;;  %s2228_s15 = smov 4  }
  0x36   : > { %1399 = dma.hbm_to_vmem [thread:$0]  (!%p1863_p11), %s2240_s2, 256, %s1856_s9, [#allocation7], %s2227_s13, %s2227_s13, %s2228_s15  }
  0x37   : > { %s2242_s3 = sld [smem:[#allocation22_spill]] }
  0x3d   : > { %s1539_s28 = scalar_lea.hbm %s2242_s3, 256 }
  0x3e   : > { %p1540_p1 = scmp.ne.s32.totalorder %s2242_s3, %s1539_s28  ;;  %p1546_p10 = scmp.lt.u32.totalorder %s1539_s28, %s2242_s3 }
  0x40   : > { %p1542_p2 = pnand %p1540_p1, %p1879_p13 }
  0x42   : > { %p1543_p6 = pneg %p1542_p2 }
  0x44   : > { %p1548_p3 = pnand %p1546_p10, %p1543_p6 }
  0x46   : > { %1551 = shalt.err (!%p1548_p3)
}
  0x47   : > { %s1552_s9 = scalar_lea.vmem %s1867_s12, 256  ;;  %p1560_p12 = scmp.lt.s32.totalorder %s1867_s12, %s1867_s12 }
  0x48   : > { %p1553_p5 = scmp.ne.s32.totalorder %s1867_s12, %s1552_s9  ;;  %p1561_p0 = scmp.lt.s32.totalorder %s1552_s9, %s1552_s9 }
  0x4a   : > { %p1555_p7 = pnand %p1553_p5, %p1879_p13  ;;  %p1562_p1 = por %p1561_p0, %p1560_p12 }
  0x4c   : > { %p1556_p9 = pneg %p1555_p7 }
  0x4e   : > { %p1563_p2 = pnand %p1562_p1, %p1556_p9 }
  0x50   : > { %1566 = shalt.err (!%p1563_p2)
}
  0x51   : > { %1402 = dma.hbm_to_vmem [thread:$0]  (!%p1863_p11), %s2242_s3, 256, %s1867_s12, [#allocation10], %s2227_s13, %s2227_s13, %s2228_s15  }
  0x52   : > { %s2243_s4 = sld [smem:[#allocation23_spill]] }
  0x58   : > { %s1567_s18 = scalar_lea.hbm %s2243_s4, 256 }
  0x59   : > { %p1568_p6 = scmp.ne.s32.totalorder %s2243_s4, %s1567_s18  ;;  %p1574_p5 = scmp.lt.u32.totalorder %s1567_s18, %s2243_s4 }
  0x5b   : > { %p1570_p10 = pnand %p1568_p6, %p1879_p13 }
  0x5d   : > { %p1571_p3 = pneg %p1570_p10 }
  0x5f   : > { %p1576_p7 = pnand %p1574_p5, %p1571_p3 }
  0x61   : > { %1579 = shalt.err (!%p1576_p7)
}
  0x62   : > { %s1580_s9 = scalar_lea.vmem %s248_s14, 256  ;;  %p1588_p1 = scmp.lt.s32.totalorder %s248_s14, %s248_s14 }
  0x63   : > { %p1581_p9 = scmp.ne.s32.totalorder %s248_s14, %s1580_s9  ;;  %p1589_p2 = scmp.lt.s32.totalorder %s1580_s9, %s1580_s9 }
  0x65   : > { %p1583_p12 = pnand %p1581_p9, %p1879_p13  ;;  %p1590_p4 = por %p1589_p2, %p1588_p1 }
  0x67   : > { %p1584_p0 = pneg %p1583_p12 }
  0x69   : > { %p1591_p8 = pnand %p1590_p4, %p1584_p0 }
  0x6b   : > { %1594 = shalt.err (!%p1591_p8)
}
  0x6c   : > { %1405 = dma.hbm_to_vmem [thread:$0]  (!%p1863_p11), %s2243_s4, 256, %s248_s14, [#allocation10], %s2227_s13, %s2227_s13, %s2228_s15  }
  0x6d   : > { %s45_s20 = sadd.s32 1, %s1737_s23  ;;  %s38_s10 = sadd.s32 1, %s1745_s25 }
  0x6e   : > { %p52_p4 = scmp.ne.s32.totalorder %s1737_s23, %s1733_s22  ;;  %p40_p8 = scmp.ge.s32.totalorder %s38_s10, 2 }
  0x6f   : > { %p53_p13 = scmp.eq.s32.totalorder %s1749_s26, 0  ;;  %p2244_p6 = scmp.eq.s32.totalorder %s1833_s27, 1 }
  0x70   : > { %p1420_p3 = scmp.lt.s32.totalorder %s1749_s26, 2  ;;  %s2268_s10 = smov (%p40_p8, %s38_s10), 0 }
  0x71   : > { %p1958_p10 = por %p2244_p6, %p52_p4  ;;  %p54_p5 = por %p53_p13, %p52_p4 }
  0x72   : > { %s1966_s16 = sand.u32 1, %s1737_s23   ;;  %s42_s14 = ssub.s32 %s1745_s25, %s2268_s10 }
  0x73   : > { %s2245_s30 = scalar_select %p1958_p10, 1, 0 }
  0x74   : > { %p43_p11 = scmp.eq.s32.totalorder %s42_s14, 0  ;;  %s1232_s17 = sshll.u32 %s1966_s16, 3 }
  0x75   : > { %s1269_s18 = sshll.u32 %s1745_s25, 7  ;;  %s2246_s0 = sld [smem:[#allocation20_spill]] }
  0x76   : > { %s1973_s19 = scalar_select %p43_p11, %s1737_s23, %s45_s20  }
  0x77   : > { %s268_s9 = scalar_lea.vmem [#allocation3], %s1232_s17  ;;  %p1984_p7 = pnand %p1420_p3, %p54_p5 }
  0x78   : > { %s275_s12 = sshll.u32 %s268_s9, 4  ;;  %s1235_s14 = sshll.u32 %s1966_s16, 2  ;;  %s1980_s12 = int_to_ptr.vmem [resolvable:$true] %s275_s12 }
  0x79   : > { %s265_s28 = scalar_lea.sflag [#allocation4], %s1966_s16  ;;  %p1597_p12 = pneg %p1984_p7 }
  0x7b   : > { %s1978_s11 = scalar_lea.hbm %s2246_s0, %s1269_s18  ;;  %s1600_s9 = scalar_lea.hbm %s2246_s0, 256 }
  0x7c   : > { %s1595_s18 = scalar_lea.hbm %s1978_s11, 128  ;;  %p1601_p2 = scmp.lt.u32.totalorder %s1978_s11, %s2246_s0 }
  0x7d   : > { %p1596_p9 = scmp.ne.s32.totalorder %s1978_s11, %s1595_s18  ;;  %p1602_p4 = scmp.lt.u32.totalorder %s1600_s9, %s1595_s18 }
  0x7e   : > { %p1604_p13 = scmp.lt.u32.totalorder %s1595_s18, %s1978_s11 }
  0x7f   : > { %p1598_p0 = pnand %p1597_p12, %p1596_p9  ;;  %p1603_p8 = por %p1602_p4, %p1601_p2 }
  0x81   : > { %p1599_p1 = pneg %p1598_p0  ;;  %p1605_p6 = por %p1604_p13, %p1603_p8 }
  0x83   : > { %p1606_p3 = pnand %p1605_p6, %p1599_p1 }
  0x85   : > { %1609 = shalt.err (!%p1606_p3)
}
  0x86   : > { %s1610_s20 = scalar_lea.vmem %s1980_s12, 128  ;;  %s1756_s17 = smov [#allocation3]  }
  0x87   : > { %p1611_p5 = scmp.ne.s32.totalorder %s1980_s12, %s1610_s20  ;;  %s1615_s8 = sshll.u32 %s1756_s17, 4  ;;  %s1616_s8 = int_to_ptr.vmem [resolvable:$false] %s1615_s8 }
  0x88   : > { %s1617_s13 = scalar_lea.vmem %s1616_s8, 256  ;;  %p1618_p0 = scmp.lt.s32.totalorder %s1980_s12, %s1616_s8 }
  0x89   : > { %p1613_p11 = pnand %p1611_p5, %p1597_p12  ;;  %p1619_p2 = scmp.lt.s32.totalorder %s1617_s13, %s1610_s20 }
  0x8b   : > { %p1614_p9 = pneg %p1613_p11  ;;  %p1620_p4 = por %p1619_p2, %p1618_p0 }
  0x8d   : > { %p1621_p8 = pnand %p1620_p4, %p1614_p9 }
  0x8f   : > { %1624 = shalt.err (!%p1621_p8)
}
  0x90   : > { %s2248_s15 = smov 4   ;;  %s2249_s18 = smov 64  }
  0x91   : > { %1409 = dma.hbm_to_vmem [thread:$0]  (!%p1984_p7), %s1978_s11, 128, %s1980_s12, %s265_s28, %s2249_s18, %s2249_s18, %s2248_s15  }
  0x92   : > { %s1236_s9 = sshll.u32 %s1745_s25, 6  ;;  %s289_s13 = scalar_lea.vmem [#allocation6], %s1235_s14 }
  0x93   : > { %s2025_s8 = scalar_lea.hbm %s2216_s1, %s1236_s9  ;;  %s297_s0 = sshll.u32 %s289_s13, 4  ;;  %s298_s0 = int_to_ptr.vmem [resolvable:$true] %s297_s0 }
  0x94   : > { %s2250_s2 = sand.u32 1, %s1749_s26   ;;  %s1625_s4 = scalar_lea.hbm %s2025_s8, 64 }
  0x95   : > { %s286_s3 = scalar_lea.sflag [#allocation7], %s2250_s2  ;;  %p1626_p1 = scmp.ne.s32.totalorder %s2025_s8, %s1625_s4 }
  0x96   : > { %s1630_s28 = scalar_lea.hbm %s2216_s1, 128  ;;  %p1631_p3 = scmp.lt.u32.totalorder %s2025_s8, %s2216_s1 }
  0x97   : > { %p1628_p13 = pnand %p1626_p1, %p1597_p12  ;;  %p1632_p5 = scmp.lt.u32.totalorder %s1630_s28, %s1625_s4 }
  0x98   : > { %p1634_p9 = scmp.lt.u32.totalorder %s1625_s4, %s2025_s8 }
  0x99   : > { %p1629_p6 = pneg %p1628_p13  ;;  %p1633_p11 = por %p1632_p5, %p1631_p3 }
  0x9b   : > { %p1635_p0 = por %p1634_p9, %p1633_p11 }
  0x9d   : > { %p1636_p2 = pnand %p1635_p0, %p1629_p6 }
  0x9f   : > { %1639 = shalt.err (!%p1636_p2)
}
  0xa0   : > { %s1640_s2 = scalar_lea.vmem %s298_s0, 64  ;;  %s1757_s14 = smov [#allocation6]  }
  0xa1   : > { %p1641_p4 = scmp.ne.s32.totalorder %s298_s0, %s1640_s2  ;;  %s1645_s18 = sshll.u32 %s1757_s14, 4  ;;  %s1646_s18 = int_to_ptr.vmem [resolvable:$false] %s1645_s18 }
  0xa2   : > { %s1647_s9 = scalar_lea.vmem %s1646_s18, 128  ;;  %p1648_p13 = scmp.lt.s32.totalorder %s298_s0, %s1646_s18 }
  0xa3   : > { %p1643_p8 = pnand %p1641_p4, %p1597_p12  ;;  %p1649_p10 = scmp.lt.s32.totalorder %s1647_s9, %s1640_s2 }
  0xa5   : > { %p1644_p1 = pneg %p1643_p8  ;;  %p1650_p3 = por %p1649_p10, %p1648_p13 }
  0xa7   : > { %p1651_p5 = pnand %p1650_p3, %p1644_p1 }
  0xa9   : > { %1654 = shalt.err (!%p1651_p5)
}
  0xaa   : > { %1412 = dma.hbm_to_vmem [thread:$0]  (!%p1984_p7), %s2025_s8, 64, %s298_s0, %s286_s3  }
  0xab   : > { %p2251_p6 = scmp.ne.s32.totalorder %s2238_s7, 0 }
  0xac   : > { %s2053_s4 = sand.u32 (!%p2251_p6), 1, %s1733_s22   ;;  %p2252_p12 = scmp.ne.s32.totalorder (!%p2251_p6), %s2235_s29, 0 }
  0xad   : > { %306 = sbr.rel (%p2251_p6) target bundleno = 1496 (0x5d8), region = 44  ;;  %s1238_s17 = sshll.u32 (!%p2251_p6), %s2053_s4, 3 }
  0xae   : > { %s309_s20 = scalar_lea.sflag (!%p2251_p6), [#allocation4], %s2053_s4  ;;  %s312_s13 = scalar_lea.vmem (!%p2251_p6), [#allocation3], %s1238_s17 }
  0xb4   : > { %1708 = dma.done.wait (%p2252_p12), %s309_s20, 128  }
  0xb5   : > { %1710 = vsyncadd (%p2252_p12), %s309_s20, 4294967168  ;;  %s317_s0 = sand.u32 1, %s1833_s27   ;;  %s1239_s3 = sshll.u32 %s2053_s4, 2 }
  0xb6   : > { %s318_s7 = scalar_lea.sflag [#allocation7], %s317_s0  ;;  %s321_s21 = scalar_lea.vmem [#allocation6], %s1239_s3 }
  0xb7   : > { %1712 = dma.done.wait (%p2252_p12), %s318_s7, 64  }
  0xb8   : > { %1714 = vsyncadd (%p2252_p12), %s318_s7, 4294967232  ;;  %p2253_p10 = scmp.eq.s32.totalorder %s1833_s27, 0 }
  0xba   : > { %1716 = dma.done.wait (%p2253_p10), [#allocation7], 256   ;;  %p2254_p7 = pmov %p2253_p10 }
  0xbc   : > { %1718 = vsyncadd (%p2254_p7), [#allocation7], 4294967040  ;;  %p2255_p11 = pmov %p2254_p7 }
  0xbd   : > { %p2256_p9 = pmov %p2254_p7 }
  0xbe   : > { %1720 = dma.done.wait (%p2255_p11), [#allocation10], 512  }
  0xbf   : > { %1722 = vsyncadd (%p2256_p9), [#allocation10], 4294966784  ;;  %v1758_v0 = vmov 0.0   ;;  %vm1759_vm0 = vmmov 0   ;;  %v1486_v1 = vld [vmem:[#allocation9] sm:$0xff]   ;;  %v1487_v2 = vld [vmem:[#allocation9 + $0x8] sm:$0xff]  }
  0xc0   : > { %1298 = vmatprep.subr.bf16.mxu0 %v1758_v0  ;;  %1302 = vmatprep.mubr.msk.bf16.mxu0 %vm1759_vm0, %v1758_v0  ;;  %v1488_v3 = vld [vmem:[%s312_s13] sm:$0xff]   ;;  %vm395_vm1 = vcmask 261120   ;;  %v1489_v4 = vld [vmem:[#allocation8] sm:$0xff]   ;;  %v502_v6 = vld [vmem:[%s321_s21] sm:$0xf]  ;;  %vm567_vm2 = vcmask 64512  }
  0xc1   : > { %1306 = vmatprep.subr.bf16.mxu1 %v1758_v0  ;;  %1310 = vmatprep.mubr.msk.bf16.mxu1 %vm1759_vm0, %v1758_v0  ;;  %v1490_v5 = vld [vmem:[#allocation8 + $0x8] sm:$0xff]   ;;  %v1491_v7 = vld [vmem:[#allocation11] sm:$0xff]   ;;  %s1760_s27 = smov 112   ;;  %s1761_s29 = smov 120   ;;  %vm614_vm3 = vcmask 130048   ;;  %vm1015_vm4 = vcmask 195584  }
  0xc2   : > { %1299 = vmatpush3.bf16.msra.mxu0 %v1486_v1  ;;  %1307 = vmatpush3.bf16.msra.mxu1 %v1491_v7  ;;  %v1492_v8 = vld [vmem:[#allocation11 + $0x8] sm:$0xff]   ;;  %s1762_s8 = smov 104   ;;  %s1763_s15 = smov 8   ;;  %vm1077_vm5 = vcmask 257024  }
  0xc3   : > { %1300 = vmatprep.subr.bf16.mxu0 %v1758_v0  ;;  %1308 = vmatprep.subr.bf16.mxu1 %v1758_v0  ;;  %s1764_s2 = smov 16   ;;  %s1765_s14 = smov 24  }
  0xc4   : > { %s1266_s18 = sshll.u32 %s1741_s24, 6  ;;  %s366_s9 = scalar_lea.vmem [#allocation12], %s1239_s3 }
  0xc5   : > { %s1094_s17 = sshll.u32 %s366_s9, 4  ;;  %s2166_s0 = scalar_lea.hbm %s2221_s6, %s1266_s18  ;;  %s2168_s17 = int_to_ptr.vmem [resolvable:$true] %s1094_s17 }
  0xc6   : > { %1301 = vmatpush3.bf16.msra.mxu0 %v1487_v2  ;;  %1309 = vmatpush3.bf16.msra.mxu1 %v1492_v8  ;;  %s1080_s24 = scalar_lea.sflag [#allocation5], %s2053_s4  ;;  %s1655_s3 = scalar_lea.vmem %s2168_s17, 64 }
  0xc7   : > { %1314 = vmatprep.subr.bf16.mxu0 %v1758_v0  ;;  %1322 = vmatprep.subr.bf16.mxu1 %v1758_v0  ;;  %p1656_p0 = scmp.ne.s32.totalorder %s2168_s17, %s1655_s3  ;;  %p2257_p2 = scmp.ne.s32.totalorder %s2245_s30, 0 }
  0xc8   : > { %s1766_s7 = smov [#allocation12]  }
  0xc9   : > { %1303 = vmatmul.mubr.msk.bf16.vlgmr.msra.gmra.mrb[0].mxu0 %vm395_vm1, %v1488_v3  ;;  %1311 = vmatmul.mubr.msk.bf16.vlgmr.msra.gmra.mrb[0].mxu1 %vm395_vm1, %v1488_v3  ;;  %p1657_p4 = pnand %p1656_p0, %p2257_p2  ;;  %s1659_s21 = sshll.u32 %s1766_s7, 4  ;;  %s1660_s21 = int_to_ptr.vmem [resolvable:$false] %s1659_s21 }
  0xca   : > { %1315 = vmatpush3.bf16.msra.mxu0 %v1489_v4  ;;  %1318 = vmatprep.mubr.msk.bf16.mxu0 %vm1759_vm0, %v1758_v0  ;;  %p1662_p1 = scmp.lt.s32.totalorder %s2168_s17, %s1660_s21 }
  0xcb   : > { %1316 = vmatprep.subr.bf16.mxu0 %v1758_v0  ;;  %1324 = vmatprep.mubr.msk.bf16.mxu1 %vm1759_vm0, %v1758_v0  ;;  %p1658_p8 = pneg %p1657_p4 }
  0xce   : > { %1317 = vmatpush3.bf16.msra.mxu0 %v1490_v5 }
  0xcf   : > { %1328 = vmatprep.subr.bf16.mxu0 %v1758_v0 }
  0xd1   : > { %1319 = vmatmul.mubr.msk.bf16.vlgmr.msra.gmra.mrb[4].mxu0 %vm395_vm1, %v502_v6 }
  0xd2   : > { %1330 = vmatprep.mubr.msk.bf16.mxu0 %vm1759_vm0, %v1758_v0 }
 0x19c   : > { %v433_v9 = vpop.f32.mrb[0].mxu0  ;;  %v492_v21 = vpop.f32.mrb[0].mxu1 }
 0x19d   : > { %v1304_v10 = vpop.f32.mrb[1].mxu0  ;;  %v1312_v22 = vpop.f32.mrb[1].mxu1 }
 0x19e   : > { %v436_v11 = vpop.f32.mrb[2].mxu0  ;;  %v495_v23 = vpop.f32.mrb[2].mxu1 }
 0x19f   : > { %v440_v12 = vpack.c.bf16 %v436_v11, %v433_v9  ;;  %v1305_v13 = vpop.f32.mrb[3].mxu0  ;;  %v499_v24 = vpack.c.bf16 %v495_v23, %v492_v21  ;;  %v1313_v25 = vpop.f32.mrb[3].mxu1 }
 0x1a1   : > { %441 = vst.msk [vmem:[#allocation2] sm:$0xff] %vm395_vm1, %v440_v12  ;;  %501 = vst.msk [vmem:[#allocation2 + $0x8] sm:$0xff] %vm395_vm1, %v499_v24 }
 0x1a4   : > { %v557_v14 = vpop.f32.mrb[4].mxu0 }
 0x1a5   : > { %v1320_v15 = vpop.f32.mrb[5].mxu0  ;;  %v563_v19 = vpack.c.bf16 %v557_v14, %v557_v14 }
 0x1a6   : > { %v560_v16 = vpop.f32.mrb[6].mxu0 }
 0x1a7   : > { %v1321_v17 = vpop.f32.mrb[7].mxu0 }
 0x1a8   : > { %v564_v18 = vld [vmem:[#allocation2] sm:$0xff]  ;;  %v566_v26 = vld [vmem:[#allocation2 + $0x8] sm:$0xff] }
 0x1a9   : > { %785 = vrot.lane.b32.xlu1 %v564_v18, %s1760_s27  ;;  %675 = vrot.lane.b32.xlu0 %v564_v18, %s1761_s29  ;;  %v572_v20 = vsel %vm567_vm2, %v564_v18, 0 }
 0x1aa   : > { %1323 = vmatpush3.bf16.xpose.msra.mxu1 %v572_v20  ;;  %1329 = vmatpush3.bf16.msra.mxu0 %v566_v26 }
 0x1ab   : > { %1334 = vmatprep.subr.bf16.mxu1 %v1758_v0  ;;  %1340 = vmatprep.subr.bf16.mxu0 %v1758_v0 }
 0x1ad   : > { %783 = vrot.lane.b32.xlu1 %v563_v19, %s1760_s27  ;;  %672 = vrot.lane.b32.xlu0 %v563_v19, %s1761_s29 }
 0x1b1   : > { %892 = vrot.lane.b32.xlu1 %v563_v19, %s1762_s8  ;;  %894 = vrot.lane.b32.xlu0 %v564_v18, %s1762_s8 }
 0x1b2   : > { %1325 = vmatmul.mubr.msk.bf16.vlgmr.msra.gmra.mrb[4].mxu1 %vm567_vm2, %v563_v19 }
 0x1b3   : > { %1336 = vmatprep.mubr.msk.bf16.mxu1 %vm1759_vm0, %v1758_v0 }
 0x21b   : > { %v676_v27 = vpop.permute.xlu0 %675  ;;  %v786_v29 = vpop.permute.xlu1 %785 }
 0x21c   : > { %v681_v28 = vsel %vm567_vm2, %v676_v27, 0  ;;  %v791_v31 = vsel %vm567_vm2, %v786_v29, 0 }
 0x21d   : > { %1335 = vmatpush3.bf16.xpose.msra.mxu1 %v681_v28  ;;  %v1493_v28 = vld [vmem:[%s2220_s5] sm:$0xff]  }
 0x21e   : > { %1346 = vmatprep.subr.bf16.mxu1 %v1758_v0 }
 0x21f   : > { %v673_v30 = vpop.permute.xlu0 %672  ;;  %v784_v33 = vpop.permute.xlu1 %783 }
 0x223   : > { %v895_v32 = vpop.permute.xlu0 %894  ;;  %v893_v35 = vpop.permute.xlu1 %892 }
 0x224   : > { %1337 = vmatmul.mubr.msk.bf16.vlgmr.msra.gmra.mrb[8].mxu1 %vm567_vm2, %v673_v30  ;;  %v900_v34 = vsel %vm567_vm2, %v895_v32, 0  ;;  %v1494_v32 = vld [vmem:[%s2220_s5 + $0x8] sm:$0xff]  }
 0x225   : > { %1347 = vmatpush3.bf16.xpose.msra.mxu1 %v791_v31  ;;  %1348 = vmatprep.mubr.msk.bf16.mxu1 %vm1759_vm0, %v1758_v0 }
 0x226   : > { %1358 = vmatprep.subr.bf16.mxu1 %v1758_v0 }
 0x22c   : > { %1349 = vmatmul.mubr.msk.bf16.vlgmr.msra.gmra.mrb[12].mxu1 %vm567_vm2, %v784_v33 }
 0x22d   : > { %1359 = vmatpush3.bf16.xpose.msra.mxu1 %v900_v34  ;;  %1360 = vmatprep.mubr.msk.bf16.mxu1 %vm1759_vm0, %v1758_v0 }
 0x22e   : > { %1370 = vmatprep.subr.bf16.mxu1 %v1758_v0 }
 0x234   : > { %1361 = vmatmul.mubr.msk.bf16.vlgmr.msra.gmra.mrb[16].mxu1 %vm567_vm2, %v893_v35 }
 0x235   : > { %1374 = vmatprep.mubr.msk.bf16.mxu1 %vm1759_vm0, %v1758_v0  ;;  %1371 = vmatpush3.bf16.msra.mxu1 %v1493_v28 }
 0x236   : > { %1372 = vmatprep.subr.bf16.mxu1 %v1758_v0 }
 0x239   : > { %1373 = vmatpush3.bf16.msra.mxu1 %v1494_v32 }
 0x285   : > { %v608_v36 = vpop.f32.mrb[4].mxu1 }
 0x286   : > { %v1326_v37 = vpop.f32.mrb[5].mxu1  ;;  %v615_v38 = vsel %vm614_vm3, %v608_v36, -inf }
 0x287   : > { %616 = vmax.xlane.f32.xlu0 %v615_v38  ;;  %v611_v39 = vpop.f32.mrb[6].mxu1 }
 0x288   : > { %v1327_v40 = vpop.f32.mrb[7].mxu1 }
 0x2f7   : > { %v717_v41 = vpop.f32.mrb[8].mxu1 }
 0x2f8   : > { %v1338_v42 = vpop.f32.mrb[9].mxu1  ;;  %v723_v43 = vsel %vm614_vm3, %v717_v41, -inf }
 0x2f9   : > { %724 = vmax.xlane.f32.xlu1 %v723_v43  ;;  %v720_v44 = vpop.f32.mrb[10].mxu1 }
 0x2fa   : > { %v1339_v45 = vpop.f32.mrb[11].mxu1 }
 0x2ff   : > { %v827_v46 = vpop.f32.mrb[12].mxu1 }
 0x300   : > { %v1350_v47 = vpop.f32.mrb[13].mxu1  ;;  %v833_v48 = vsel %vm614_vm3, %v827_v46, -inf }
 0x301   : > { %834 = vmax.xlane.f32.xlu0 %v833_v48  ;;  %v830_v49 = vpop.f32.mrb[14].mxu1 }
 0x302   : > { %v1351_v50 = vpop.f32.mrb[15].mxu1 }
 0x307   : > { %v936_v51 = vpop.f32.mrb[16].mxu1 }
 0x308   : > { %v1362_v52 = vpop.f32.mrb[17].mxu1  ;;  %v942_v53 = vsel %vm614_vm3, %v936_v51, -inf }
 0x309   : > { %943 = vmax.xlane.f32.xlu0 %v942_v53  ;;  %v939_v54 = vpop.f32.mrb[18].mxu1 }
 0x30a   : > { %734 = vrot.lane.b32.xlu1 %v566_v26, %s1761_s29  ;;  %v1363_v55 = vpop.f32.mrb[19].mxu1 }
 0x30e   : > { %952 = vrot.lane.b32.xlu1 %v566_v26, %s1762_s8 }
 0x314   : > { %v617_v56 = vpop.xlane.xlu0 %616 }
 0x315   : > { %v618_v57 = vsub.f32 %v608_v36, %v617_v56 }
 0x317   : > { %v619_v58 = vmul.f32 1.442695, %v618_v57 }
 0x319   : > { %1495 = vpow2.f32 %v619_v58 }
 0x31f   : > { %843 = vrot.lane.b32.xlu0 %v566_v26, %s1760_s27  ;;  %s1661_s27 = scalar_lea.vmem %s1660_s21, 128 }
 0x320   : > { %p1663_p13 = scmp.lt.s32.totalorder %s1661_s27, %s1655_s3 }
 0x322   : > { %p1664_p3 = por %p1663_p13, %p1662_p1 }
 0x323   : > { %v1496_v59 = vpop.eup %1495 }
 0x324   : > { %v624_v60 = vpack.c.bf16 %v1496_v59, %v1496_v59  ;;  %v621_v12 = vsel %vm614_vm3, %v1496_v59, 0.0  ;;  %p1665_p5 = pnand %p1664_p3, %p1658_p8 }
 0x326   : > { %1331 = vmatmul.mubr.msk.bf16.vlgmr.msra.gmra.mrb[8].mxu0 %vm614_vm3, %v624_v60 }
 0x327   : > { %1342 = vmatprep.mubr.msk.bf16.mxu0 %vm1759_vm0, %v1758_v0 }
 0x386   : > { %v725_v61 = vpop.xlane.xlu1 %724 }
 0x387   : > { %v726_v62 = vsub.f32 %v717_v41, %v725_v61 }
 0x389   : > { %v727_v63 = vmul.f32 1.442695, %v726_v62 }
 0x38a   : > { %v735_v1 = vpop.permute.xlu1 %734 }
 0x38b   : > { %1497 = vpow2.f32 %v727_v63  ;;  %1341 = vmatpush3.bf16.msra.mxu0 %v735_v1 }
 0x38c   : > { %1352 = vmatprep.subr.bf16.mxu0 %v1758_v0 }
 0x38e   : > { %v835_v2 = vpop.xlane.xlu0 %834  ;;  %v953_v16 = vpop.permute.xlu1 %952 }
 0x38f   : > { %v836_v3 = vsub.f32 %v827_v46, %v835_v2 }
 0x391   : > { %v837_v4 = vmul.f32 1.442695, %v836_v3 }
 0x393   : > { %1499 = vpow2.f32 %v837_v4 }
 0x395   : > { %v1498_v5 = vpop.eup %1497 }
 0x396   : > { %v944_v6 = vpop.xlane.xlu0 %943  ;;  %v729_v7 = vsel %vm614_vm3, %v1498_v5, 0.0  ;;  %v732_v8 = vpack.c.bf16 %v1498_v5, %v1498_v5 }
 0x397   : > { %v945_v9 = vsub.f32 %v936_v51, %v944_v6  ;;  %730 = vadd.xlane.f32.xlu1 %v729_v7 }
 0x398   : > { %1343 = vmatmul.mubr.msk.bf16.vlgmr.msra.gmra.mrb[12].mxu0 %vm614_vm3, %v732_v8 }
 0x399   : > { %v946_v10 = vmul.f32 1.442695, %v945_v9  ;;  %1354 = vmatprep.mubr.msk.bf16.mxu0 %vm1759_vm0, %v1758_v0 }
 0x39a   : > { %v844_v11 = vpop.permute.xlu0 %843 }
 0x39b   : > { %1501 = vpow2.f32 %v946_v10  ;;  %622 = vadd.xlane.f32.xlu1 %v621_v12  ;;  %1353 = vmatpush3.bf16.msra.mxu0 %v844_v11 }
 0x39c   : > { %1364 = vmatprep.subr.bf16.mxu0 %v1758_v0 }
 0x39d   : > { %v1500_v13 = vpop.eup %1499 }
 0x39e   : > { %v839_v14 = vsel %vm614_vm3, %v1500_v13, 0.0  ;;  %v842_v15 = vpack.c.bf16 %v1500_v13, %v1500_v13 }
 0x39f   : > { %840 = vadd.xlane.f32.xlu0 %v839_v14 }
 0x3a0   : > { %1355 = vmatmul.mubr.msk.bf16.vlgmr.msra.gmra.mrb[16].mxu0 %vm614_vm3, %v842_v15 }
 0x3a1   : > { %1365 = vmatpush3.bf16.msra.mxu0 %v953_v16  ;;  %1366 = vmatprep.mubr.msk.bf16.mxu0 %vm1759_vm0, %v1758_v0 }
 0x3a5   : > { %v1502_v17 = vpop.eup %1501 }
 0x3a6   : > { %v948_v18 = vsel %vm614_vm3, %v1502_v17, 0.0  ;;  %v951_v19 = vpack.c.bf16 %v1502_v17, %v1502_v17 }
 0x3a7   : > { %949 = vadd.xlane.f32.xlu0 %v948_v18 }
 0x3a8   : > { %1367 = vmatmul.mubr.msk.bf16.vlgmr.msra.gmra.mrb[20].mxu0 %vm614_vm3, %v951_v19 }
 0x3f9   : > { %v662_v20 = vpop.f32.mrb[8].mxu0 }
 0x3fa   : > { %v1332_v21 = vpop.f32.mrb[9].mxu0 }
 0x3fb   : > { %v665_v22 = vpop.f32.mrb[10].mxu0 }
 0x3fc   : > { %v1333_v23 = vpop.f32.mrb[11].mxu0 }
 0x424   : > { %v731_v24 = vpop.xlane.xlu1 %730 }
 0x425   : > { %1503 = vrcp.f32 %v731_v24 }
 0x428   : > { %v623_v49 = vpop.xlane.xlu1 %622 }
 0x42c   : > { %v841_v25 = vpop.xlane.xlu0 %840 }
 0x42d   : > { %1505 = vrcp.f32 %v841_v25 }
 0x42f   : > { %v1504_v26 = vpop.eup %1503 }
 0x434   : > { %v950_v33 = vpop.xlane.xlu0 %949 }
 0x435   : > { %1507 = vrcp.f32 %v950_v33 }
 0x436   : > { %1509 = vrcp.f32 %v623_v49 }
 0x437   : > { %v1506_v36 = vpop.eup %1505 }
 0x43f   : > { %v1508_v43 = vpop.eup %1507 }
 0x440   : > { %v1510_v50 = vpop.eup %1509 }
 0x441   : > { %v669_v51 = vmul.f32 %v1510_v50, %v662_v20 }
 0x443   : > { %v670_v54 = vpack.c.bf16 %v669_v51, %v669_v51 }
 0x46b   : > { %v774_v27 = vpop.f32.mrb[12].mxu0 }
 0x46c   : > { %v781_v29 = vmul.f32 %v1504_v26, %v774_v27  ;;  %v1344_v30 = vpop.f32.mrb[13].mxu0 }
 0x46d   : > { %v777_v31 = vpop.f32.mrb[14].mxu0 }
 0x46e   : > { %v782_v34 = vpack.c.bf16 %v781_v29, %v781_v29  ;;  %v1345_v35 = vpop.f32.mrb[15].mxu0 }
 0x470   : > { %1002 = vrot.lane.b32.xlu0 %v782_v34, %s1763_s15 }
 0x473   : > { %v883_v37 = vpop.f32.mrb[16].mxu0 }
 0x474   : > { %v890_v38 = vmul.f32 %v1506_v36, %v883_v37  ;;  %v1356_v39 = vpop.f32.mrb[17].mxu0 }
 0x475   : > { %v886_v40 = vpop.f32.mrb[18].mxu0 }
 0x476   : > { %v891_v41 = vpack.c.bf16 %v890_v38, %v890_v38  ;;  %v1357_v42 = vpop.f32.mrb[19].mxu0 }
 0x478   : > { %1005 = vrot.lane.b32.xlu1 %v891_v41, %s1764_s2 }
 0x47b   : > { %v992_v44 = vpop.f32.mrb[20].mxu0 }
 0x47c   : > { %v999_v45 = vmul.f32 %v1508_v43, %v992_v44  ;;  %v1368_v46 = vpop.f32.mrb[21].mxu0 }
 0x47d   : > { %v995_v47 = vpop.f32.mrb[22].mxu0 }
 0x47e   : > { %v1000_v48 = vpack.c.bf16 %v999_v45, %v999_v45  ;;  %v1369_v0 = vpop.f32.mrb[23].mxu0 }
 0x480   : > { %1008 = vrot.lane.b32.xlu1 %v1000_v48, %s1765_s14 }
 0x4e2   : > { %v1003_v52 = vpop.permute.xlu0 %1002 }
 0x4e3   : > { %v1012_v55 = vsel %vm567_vm2, %v670_v54, %v1003_v52 }
 0x4ea   : > { %v1006_v53 = vpop.permute.xlu1 %1005 }
 0x4eb   : > { %v1014_v56 = vsel %vm614_vm3, %v1012_v55, %v1006_v53 }
 0x4f2   : > { %v1009_v57 = vpop.permute.xlu1 %1008 }
 0x4f3   : > { %v1017_v58 = vsel %vm1015_vm4, %v1014_v56, %v1009_v57 }
 0x4f4   : > { %1375 = vmatmul.mubr.msk.bf16.vlgmr.msra.gmra.mrb[20].mxu1 %vm395_vm1, %v1017_v58 }
 0x5c7   : > { %v1070_v59 = vpop.f32.mrb[20].mxu1 }
 0x5c8   : > { %v1076_v60 = vpack.c.bf16 %v1070_v59, %v1070_v59  ;;  %v1376_v61 = vpop.f32.mrb[21].mxu1 }
 0x5c9   : > { %v1073_v62 = vpop.f32.mrb[22].mxu1 }
 0x5ca   : > { %v1377_v63 = vpop.f32.mrb[23].mxu1  ;;  %1078 = vst.msk [vmem:[%s366_s9] sm:$0xf] %vm1077_vm5, %v1076_v60 }
 0x5cb   : > { %1668 = shalt.err (!%p1665_p5)
}
 0x5cc   : > { %s1669_s4 = scalar_lea.hbm %s2166_s0, 64  ;;  %s1673_s11 = scalar_lea.hbm %s2221_s6, 128 }
 0x5cd   : > { %p1670_p6 = scmp.ne.s32.totalorder %s2166_s0, %s1669_s4  ;;  %p1674_p7 = scmp.lt.u32.totalorder %s2166_s0, %s2221_s6 }
 0x5ce   : > { %p1675_p11 = scmp.lt.u32.totalorder %s1673_s11, %s1669_s4  ;;  %p1677_p0 = scmp.lt.u32.totalorder %s1669_s4, %s2166_s0 }
 0x5cf   : > { %p1671_p12 = pnand %p1670_p6, %p2257_p2 }
 0x5d0   : > { %p1676_p9 = por %p1675_p11, %p1674_p7 }
 0x5d1   : > { %p1672_p10 = pneg %p1671_p12 }
 0x5d2   : > { %p1678_p4 = por %p1677_p0, %p1676_p9 }
 0x5d4   : > { %p1679_p8 = pnand %p1678_p4, %p1672_p10 }
 0x5d6   : > { %1682 = shalt.err (!%p1679_p8)
}
 0x5d7   : > { %1394 = dma.vmem_to_hbm [thread:$0]  (%p2257_p2), %s2168_s17, 64, %s2166_s0, %s1080_s24  }
 0x5d8 PF: > { %s2258_s16 = sld [smem:[#allocation18_spill]]  ;;  %s2259_s15 = sld [smem:[#allocation19_spill]] }
 0x5d9   : > { %p2261_p13 = scmp.ge.s32.totalorder %s1749_s26, 2 }
 0x5de   : > { %s1106_s2 = sand.u32 1, %s2258_s16   ;;  %p2260_p1 = scmp.ne.s32.totalorder %s2259_s15, 0 }
 0x5df   : > { %s1107_s14 = scalar_lea.sflag [#allocation5], %s1106_s2 }
 0x5e0   : > { %p1414_p3 = pnand %p2261_p13, %p2260_p1 }
 0x5e2   : > { %1724 = dma.done.wait (!%p1414_p3), %s1107_s14, 64  }
 0x5e3   : > { %1726 = vsyncadd (!%p1414_p3), %s1107_s14, 4294967232  ;;  %s26_s26 = sadd.s32 1, %s1749_s26   ;;  %s2262_s21 = smov %s1733_s22 }
 0x5e4   : > { %p23_p5 = scmp.ge.s32.totalorder %s26_s26, 4   ;;  %s2263_s22 = smov %s1737_s23 }
 0x5e5   : > { %s2264_s23 = smov %s1973_s19  ;;  %s2265_s24 = smov %s1745_s25 }
 0x5e6   : > { %s2266_s25 = smov %s2268_s10  ;;  %25 = sbr.rel (!%p23_p5) target bundleno = 14 (0xe), region = 120 }
 0x5ed   :  { %1112 = vsyncpa [#allocation4], 1 }
 0x5ee   :  { %1114 = vsyncpa [#allocation4 + $0x1], 1 }
 0x5ef   :  { %1115 = vsyncpa [#allocation7], 1 }
 0x5f0   :  { %1117 = vsyncpa [#allocation7 + $0x1], 1 }
 0x5f1   :  { %1118 = vsyncpa [#allocation10], 1 }
 0x5f2   :  { %1119 = vsyncpa [#allocation5], 1 }
 0x5f3   :  { %1121 = vsyncpa [#allocation5 + $0x1], 1 }

// kernel: tpu_custom_call.1
= control target key start
LH: loop header
LB: loop body
LE: loop exit
PB: predicated region body
PF: predicated region fallthrough
CT: control target
= control target key end

     0   :  { %s2215_s0 = inlined_call_operand.hbm [shape: bf16[2,16,32], index: 0, kind: input, shape index: {}]   ;;  %s2216_s1 = inlined_call_operand.hbm [shape: bf16[2,8,32], index: 1, kind: input, shape index: {}]   ;;  %s2217_s2 = inlined_call_operand.hbm [shape: bf16[32,32], index: 2, kind: input, shape index: {}]   ;;  %s2218_s3 = inlined_call_operand.hbm [shape: bf16[32,32], index: 3, kind: input, shape index: {}]   ;;  %s2219_s4 = inlined_call_operand.hbm [shape: bf16[32,32], index: 4, kind: input, shape index: {}]   ;;  %s2220_s5 = inlined_call_operand.vmem [shape: bf16[32,32], index: 5, kind: input, shape index: {}]   ;;  %s2221_s6 = inlined_call_operand.hbm [shape: bf16[2,8,32], index: 6, kind: output, shape index: {}]  }
   0x1   :  { %2230 = sst [smem:[#allocation20_spill]] %s2215_s0 }
   0x2   :  { %2231 = sst [smem:[#allocation21_spill]] %s2217_s2 }
   0x3   :  { %2232 = sst [smem:[#allocation22_spill]] %s2218_s3 }
   0x4   :  { %2233 = sst [smem:[#allocation23_spill]] %s2219_s4 }
   0x5   :  { %11 = vsyncpa [#allocation4], 0 }
   0x6   :  { %13 = vsyncpa [#allocation4 + $0x1], 0 }
   0x7   :  { %14 = vsyncpa [#allocation7], 0 }
   0x8   :  { %16 = vsyncpa [#allocation7 + $0x1], 0 }
   0x9   :  { %17 = vsyncpa [#allocation10], 0 }
   0xa   :  { %18 = vsyncpa [#allocation5], 0 }
   0xb   :  { %20 = vsyncpa [#allocation5 + $0x1], 0  ;;  %s1802_s21 = smov 0   ;;  %s1804_s22 = smov 0  }
   0xc   :  { %s1806_s23 = smov 0   ;;  %s1808_s24 = smov 0  }
   0xd   :  { %s1810_s25 = smov 0   ;;  %s1812_s26 = smov 0  }
   0xe LB: > { %2234 = sst [smem:[#allocation18_spill]] %s1729_s21  ;;  %s1833_s27 = sadd.s32 4294967295, %s1749_s26   ;;  %s1749_s26 = sphi %s1812_s26, %s26_s26   ;;  %s1745_s25 = sphi %s1810_s25, %s2266_s25   ;;  %s1741_s24 = sphi %s1808_s24, %s2265_s24   ;;  %s1737_s23 = sphi %s1806_s23, %s2264_s23   ;;  %s1733_s22 = sphi %s1804_s22, %s2263_s22   ;;  %s1729_s21 = sphi %s1802_s21, %s2262_s21  }
   0xf   : > { %s1226_s28 = sadd.s32 4294967294, %s1749_s26   ;;  %p58_p0 = scmp.ne.s32.totalorder %s1733_s22, %s1729_s21 }
  0x10   : > { %p2222_p1 = scmp.eq.s32.totalorder %s1833_s27, 0  ;;  %p202_p3 = scmp.eq.s32.totalorder %s1226_s28, 1 }
  0x11   : > { %p1227_p5 = scmp.ge.s32.totalorder %s1749_s26, 1  ;;  %p209_p7 = scmp.lt.s32.totalorder %s1749_s26, 3 }
  0x12   : > { %p1842_p4 = por %p2222_p1, %p58_p0  ;;  %p1847_p6 = por %p202_p3, %p58_p0 }
  0x13   : > { %p1852_p8 = pnand %p1227_p5, %p209_p7  ;;  %s1751_s8 = smov [#allocation8]  }
  0x14   : > { %s2235_s29 = scalar_select %p1842_p4, 1, 0 }
  0x15   : > { %s2236_s30 = scalar_select %p1847_p6, 1, 0 }
  0x16   : > { %s2238_s7 = scalar_select %p1852_p8, 1, 0 }
  0x17   : > { %2237 = sst [smem:[#allocation19_spill]] %s2236_s30  ;;  %s221_s9 = sshll.u32 %s1751_s8, 4  ;;  %s1856_s9 = int_to_ptr.vmem [resolvable:$true] %s221_s9 }
  0x18   : > { %p1396_p9 = pneg %p1852_p8  ;;  %s1752_s11 = smov [#allocation9]  }
  0x19   : > { %s234_s12 = sshll.u32 %s1752_s11, 4  ;;  %s1753_s13 = smov [#allocation11]   ;;  %s1867_s12 = int_to_ptr.vmem [resolvable:$true] %s234_s12 }
  0x1a   : > { %p1863_p11 = pnand %p1396_p9, %p2222_p1  ;;  %s1869_s14 = sshll.u32 %s1753_s13, 4  ;;  %s248_s14 = int_to_ptr.vmem [resolvable:$true] %s1869_s14 }
  0x1b   : > { %s2240_s2 = sld [smem:[#allocation21_spill]] }
  0x1c   : > { %p1879_p13 = pneg %p1863_p11 }
  0x21   : > { %s1511_s17 = scalar_lea.hbm %s2240_s2, 256 }
  0x22   : > { %p1512_p12 = scmp.ne.s32.totalorder %s2240_s2, %s1511_s17  ;;  %p1518_p5 = scmp.lt.u32.totalorder %s1511_s17, %s2240_s2 }
  0x24   : > { %p1514_p0 = pnand %p1879_p13, %p1512_p12 }
  0x26   : > { %p1515_p3 = pneg %p1514_p0 }
  0x28   : > { %p1520_p7 = pnand %p1518_p5, %p1515_p3 }
  0x2a   : > { %1523 = shalt.err (!%p1520_p7)
}
  0x2b   : > { %s1524_s11 = scalar_lea.vmem %s1856_s9, 256  ;;  %p1532_p2 = scmp.lt.s32.totalorder %s1856_s9, %s1856_s9 }
  0x2c   : > { %p1525_p9 = scmp.ne.s32.totalorder %s1856_s9, %s1524_s11  ;;  %p1533_p6 = scmp.lt.s32.totalorder %s1524_s11, %s1524_s11 }
  0x2e   : > { %p1527_p10 = pnand %p1525_p9, %p1879_p13  ;;  %p1534_p12 = por %p1533_p6, %p1532_p2 }
  0x30   : > { %p1528_p1 = pneg %p1527_p10 }
  0x32   : > { %p1535_p0 = pnand %p1534_p12, %p1528_p1 }
  0x34   : > { %1538 = shalt.err (!%p1535_p0)
}
  0x35   : > { %s2227_s13 = smov 64   ;;  %s2228_s15 = smov 4  }
  0x36   : > { %1399 = dma.hbm_to_vmem [thread:$0]  (!%p1863_p11), %s2240_s2, 256, %s1856_s9, [#allocation7], %s2227_s13, %s2227_s13, %s2228_s15  }
  0x37   : > { %s2242_s3 = sld [smem:[#allocation22_spill]] }
  0x3d   : > { %s1539_s28 = scalar_lea.hbm %s2242_s3, 256 }
  0x3e   : > { %p1540_p1 = scmp.ne.s32.totalorder %s2242_s3, %s1539_s28  ;;  %p1546_p10 = scmp.lt.u32.totalorder %s1539_s28, %s2242_s3 }
  0x40   : > { %p1542_p2 = pnand %p1540_p1, %p1879_p13 }
  0x42   : > { %p1543_p6 = pneg %p1542_p2 }
  0x44   : > { %p1548_p3 = pnand %p1546_p10, %p1543_p6 }
  0x46   : > { %1551 = shalt.err (!%p1548_p3)
}
  0x47   : > { %s1552_s9 = scalar_lea.vmem %s1867_s12, 256  ;;  %p1560_p12 = scmp.lt.s32.totalorder %s1867_s12, %s1867_s12 }
  0x48   : > { %p1553_p5 = scmp.ne.s32.totalorder %s1867_s12, %s1552_s9  ;;  %p1561_p0 = scmp.lt.s32.totalorder %s1552_s9, %s1552_s9 }
  0x4a   : > { %p1555_p7 = pnand %p1553_p5, %p1879_p13  ;;  %p1562_p1 = por %p1561_p0, %p1560_p12 }
  0x4c   : > { %p1556_p9 = pneg %p1555_p7 }
  0x4e   : > { %p1563_p2 = pnand %p1562_p1, %p1556_p9 }
  0x50   : > { %1566 = shalt.err (!%p1563_p2)
}
  0x51   : > { %1402 = dma.hbm_to_vmem [thread:$0]  (!%p1863_p11), %s2242_s3, 256, %s1867_s12, [#allocation10], %s2227_s13, %s2227_s13, %s2228_s15  }
  0x52   : > { %s2243_s4 = sld [smem:[#allocation23_spill]] }
  0x58   : > { %s1567_s18 = scalar_lea.hbm %s2243_s4, 256 }
  0x59   : > { %p1568_p6 = scmp.ne.s32.totalorder %s2243_s4, %s1567_s18  ;;  %p1574_p5 = scmp.lt.u32.totalorder %s1567_s18, %s2243_s4 }
  0x5b   : > { %p1570_p10 = pnand %p1568_p6, %p1879_p13 }
  0x5d   : > { %p1571_p3 = pneg %p1570_p10 }
  0x5f   : > { %p1576_p7 = pnand %p1574_p5, %p1571_p3 }
  0x61   : > { %1579 = shalt.err (!%p1576_p7)
}
  0x62   : > { %s1580_s9 = scalar_lea.vmem %s248_s14, 256  ;;  %p1588_p1 = scmp.lt.s32.totalorder %s248_s14, %s248_s14 }
  0x63   : > { %p1581_p9 = scmp.ne.s32.totalorder %s248_s14, %s1580_s9  ;;  %p1589_p2 = scmp.lt.s32.totalorder %s1580_s9, %s1580_s9 }
  0x65   : > { %p1583_p12 = pnand %p1581_p9, %p1879_p13  ;;  %p1590_p4 = por %p1589_p2, %p1588_p1 }
  0x67   : > { %p1584_p0 = pneg %p1583_p12 }
  0x69   : > { %p1591_p8 = pnand %p1590_p4, %p1584_p0 }
  0x6b   : > { %1594 = shalt.err (!%p1591_p8)
}
  0x6c   : > { %1405 = dma.hbm_to_vmem [thread:$0]  (!%p1863_p11), %s2243_s4, 256, %s248_s14, [#allocation10], %s2227_s13, %s2227_s13, %s2228_s15  }
  0x6d   : > { %s45_s20 = sadd.s32 1, %s1737_s23  ;;  %s38_s10 = sadd.s32 1, %s1745_s25 }
  0x6e   : > { %p52_p4 = scmp.ne.s32.totalorder %s1737_s23, %s1733_s22  ;;  %p40_p8 = scmp.ge.s32.totalorder %s38_s10, 2 }
  0x6f   : > { %p53_p13 = scmp.eq.s32.totalorder %s1749_s26, 0  ;;  %p2244_p6 = scmp.eq.s32.totalorder %s1833_s27, 1 }
  0x70   : > { %p1420_p3 = scmp.lt.s32.totalorder %s1749_s26, 2  ;;  %s2268_s10 = smov (%p40_p8, %s38_s10), 0 }
  0x71   : > { %p1958_p10 = por %p2244_p6, %p52_p4  ;;  %p54_p5 = por %p53_p13, %p52_p4 }
  0x72   : > { %s1966_s16 = sand.u32 1, %s1737_s23   ;;  %s42_s14 = ssub.s32 %s1745_s25, %s2268_s10 }
  0x73   : > { %s2245_s30 = scalar_select %p1958_p10, 1, 0 }
  0x74   : > { %p43_p11 = scmp.eq.s32.totalorder %s42_s14, 0  ;;  %s1232_s17 = sshll.u32 %s1966_s16, 3 }
  0x75   : > { %s1269_s18 = sshll.u32 %s1745_s25, 7  ;;  %s2246_s0 = sld [smem:[#allocation20_spill]] }
  0x76   : > { %s1973_s19 = scalar_select %p43_p11, %s1737_s23, %s45_s20  }
  0x77   : > { %s268_s9 = scalar_lea.vmem [#allocation3], %s1232_s17  ;;  %p1984_p7 = pnand %p1420_p3, %p54_p5 }
  0x78   : > { %s275_s12 = sshll.u32 %s268_s9, 4  ;;  %s1235_s14 = sshll.u32 %s1966_s16, 2  ;;  %s1980_s12 = int_to_ptr.vmem [resolvable:$true] %s275_s12 }
  0x79   : > { %s265_s28 = scalar_lea.sflag [#allocation4], %s1966_s16  ;;  %p1597_p12 = pneg %p1984_p7 }
  0x7b   : > { %s1978_s11 = scalar_lea.hbm %s2246_s0, %s1269_s18  ;;  %s1600_s9 = scalar_lea.hbm %s2246_s0, 256 }
  0x7c   : > { %s1595_s18 = scalar_lea.hbm %s1978_s11, 128  ;;  %p1601_p2 = scmp.lt.u32.totalorder %s1978_s11, %s2246_s0 }
  0x7d   : > { %p1596_p9 = scmp.ne.s32.totalorder %s1978_s11, %s1595_s18  ;;  %p1602_p4 = scmp.lt.u32.totalorder %s1600_s9, %s1595_s18 }
  0x7e   : > { %p1604_p13 = scmp.lt.u32.totalorder %s1595_s18, %s1978_s11 }
  0x7f   : > { %p1598_p0 = pnand %p1597_p12, %p1596_p9  ;;  %p1603_p8 = por %p1602_p4, %p1601_p2 }
  0x81   : > { %p1599_p1 = pneg %p1598_p0  ;;  %p1605_p6 = por %p1604_p13, %p1603_p8 }
  0x83   : > { %p1606_p3 = pnand %p1605_p6, %p1599_p1 }
  0x85   : > { %1609 = shalt.err (!%p1606_p3)
}
  0x86   : > { %s1610_s20 = scalar_lea.vmem %s1980_s12, 128  ;;  %s1756_s17 = smov [#allocation3]  }
  0x87   : > { %p1611_p5 = scmp.ne.s32.totalorder %s1980_s12, %s1610_s20  ;;  %s1615_s8 = sshll.u32 %s1756_s17, 4  ;;  %s1616_s8 = int_to_ptr.vmem [resolvable:$false] %s1615_s8 }
  0x88   : > { %s1617_s13 = scalar_lea.vmem %s1616_s8, 256  ;;  %p1618_p0 = scmp.lt.s32.totalorder %s1980_s12, %s1616_s8 }
  0x89   : > { %p1613_p11 = pnand %p1611_p5, %p1597_p12  ;;  %p1619_p2 = scmp.lt.s32.totalorder %s1617_s13, %s1610_s20 }
  0x8b   : > { %p1614_p9 = pneg %p1613_p11  ;;  %p1620_p4 = por %p1619_p2, %p1618_p0 }
  0x8d   : > { %p1621_p8 = pnand %p1620_p4, %p1614_p9 }
  0x8f   : > { %1624 = shalt.err (!%p1621_p8)
}
  0x90   : > { %s2248_s15 = smov 4   ;;  %s2249_s18 = smov 64  }
  0x91   : > { %1409 = dma.hbm_to_vmem [thread:$0]  (!%p1984_p7), %s1978_s11, 128, %s1980_s12, %s265_s28, %s2249_s18, %s2249_s18, %s2248_s15  }
  0x92   : > { %s1236_s9 = sshll.u32 %s1745_s25, 6  ;;  %s289_s13 = scalar_lea.vmem [#allocation6], %s1235_s14 }
  0x93   : > { %s2025_s8 = scalar_lea.hbm %s2216_s1, %s1236_s9  ;;  %s297_s0 = sshll.u32 %s289_s13, 4  ;;  %s298_s0 = int_to_ptr.vmem [resolvable:$true] %s297_s0 }
  0x94   : > { %s2250_s2 = sand.u32 1, %s1749_s26   ;;  %s1625_s4 = scalar_lea.hbm %s2025_s8, 64 }
  0x95   : > { %s286_s3 = scalar_lea.sflag [#allocation7], %s2250_s2  ;;  %p1626_p1 = scmp.ne.s32.totalorder %s2025_s8, %s1625_s4 }
  0x96   : > { %s1630_s28 = scalar_lea.hbm %s2216_s1, 128  ;;  %p1631_p3 = scmp.lt.u32.totalorder %s2025_s8, %s2216_s1 }
  0x97   : > { %p1628_p13 = pnand %p1626_p1, %p1597_p12  ;;  %p1632_p5 = scmp.lt.u32.totalorder %s1630_s28, %s1625_s4 }
  0x98   : > { %p1634_p9 = scmp.lt.u32.totalorder %s1625_s4, %s2025_s8 }
  0x99   : > { %p1629_p6 = pneg %p1628_p13  ;;  %p1633_p11 = por %p1632_p5, %p1631_p3 }
  0x9b   : > { %p1635_p0 = por %p1634_p9, %p1633_p11 }
  0x9d   : > { %p1636_p2 = pnand %p1635_p0, %p1629_p6 }
  0x9f   : > { %1639 = shalt.err (!%p1636_p2)
}
  0xa0   : > { %s1640_s2 = scalar_lea.vmem %s298_s0, 64  ;;  %s1757_s14 = smov [#allocation6]  }
  0xa1   : > { %p1641_p4 = scmp.ne.s32.totalorder %s298_s0, %s1640_s2  ;;  %s1645_s18 = sshll.u32 %s1757_s14, 4  ;;  %s1646_s18 = int_to_ptr.vmem [resolvable:$false] %s1645_s18 }
  0xa2   : > { %s1647_s9 = scalar_lea.vmem %s1646_s18, 128  ;;  %p1648_p13 = scmp.lt.s32.totalorder %s298_s0, %s1646_s18 }
  0xa3   : > { %p1643_p8 = pnand %p1641_p4, %p1597_p12  ;;  %p1649_p10 = scmp.lt.s32.totalorder %s1647_s9, %s1640_s2 }
  0xa5   : > { %p1644_p1 = pneg %p1643_p8  ;;  %p1650_p3 = por %p1649_p10, %p1648_p13 }
  0xa7   : > { %p1651_p5 = pnand %p1650_p3, %p1644_p1 }
  0xa9   : > { %1654 = shalt.err (!%p1651_p5)
}
  0xaa   : > { %1412 = dma.hbm_to_vmem [thread:$0]  (!%p1984_p7), %s2025_s8, 64, %s298_s0, %s286_s3  }
  0xab   : > { %p2251_p6 = scmp.ne.s32.totalorder %s2238_s7, 0 }
  0xac   : > { %s2053_s4 = sand.u32 (!%p2251_p6), 1, %s1733_s22   ;;  %p2252_p12 = scmp.ne.s32.totalorder (!%p2251_p6), %s2235_s29, 0 }
  0xad   : > { %306 = sbr.rel (%p2251_p6) target bundleno = 1496 (0x5d8), region = 44  ;;  %s1238_s17 = sshll.u32 (!%p2251_p6), %s2053_s4, 3 }
  0xae   : > { %s309_s20 = scalar_lea.sflag (!%p2251_p6), [#allocation4], %s2053_s4  ;;  %s312_s13 = scalar_lea.vmem (!%p2251_p6), [#allocation3], %s1238_s17 }
  0xb4   : > { %1708 = dma.done.wait (%p2252_p12), %s309_s20, 128  }
  0xb5   : > { %1710 = vsyncadd (%p2252_p12), %s309_s20, 4294967168  ;;  %s317_s0 = sand.u32 1, %s1833_s27   ;;  %s1239_s3 = sshll.u32 %s2053_s4, 2 }
  0xb6   : > { %s318_s7 = scalar_lea.sflag [#allocation7], %s317_s0  ;;  %s321_s21 = scalar_lea.vmem [#allocation6], %s1239_s3 }
  0xb7   : > { %1712 = dma.done.wait (%p2252_p12), %s318_s7, 64  }
  0xb8   : > { %1714 = vsyncadd (%p2252_p12), %s318_s7, 4294967232  ;;  %p2253_p10 = scmp.eq.s32.totalorder %s1833_s27, 0 }
  0xba   : > { %1716 = dma.done.wait (%p2253_p10), [#allocation7], 256   ;;  %p2254_p7 = pmov %p2253_p10 }
  0xbc   : > { %1718 = vsyncadd (%p2254_p7), [#allocation7], 4294967040  ;;  %p2255_p11 = pmov %p2254_p7 }
  0xbd   : > { %p2256_p9 = pmov %p2254_p7 }
  0xbe   : > { %1720 = dma.done.wait (%p2255_p11), [#allocation10], 512  }
  0xbf   : > { %1722 = vsyncadd (%p2256_p9), [#allocation10], 4294966784  ;;  %v1758_v0 = vmov 0.0   ;;  %vm1759_vm0 = vmmov 0   ;;  %v1486_v1 = vld [vmem:[#allocation9] sm:$0xff]   ;;  %v1487_v2 = vld [vmem:[#allocation9 + $0x8] sm:$0xff]  }
  0xc0   : > { %1298 = vmatprep.subr.bf16.mxu0 %v1758_v0  ;;  %1302 = vmatprep.mubr.msk.bf16.mxu0 %vm1759_vm0, %v1758_v0  ;;  %v1488_v3 = vld [vmem:[%s312_s13] sm:$0xff]   ;;  %vm395_vm1 = vcmask 261120   ;;  %v1489_v4 = vld [vmem:[#allocation8] sm:$0xff]   ;;  %v502_v6 = vld [vmem:[%s321_s21] sm:$0xf]  ;;  %vm567_vm2 = vcmask 64512  }
  0xc1   : > { %1306 = vmatprep.subr.bf16.mxu1 %v1758_v0  ;;  %1310 = vmatprep.mubr.msk.bf16.mxu1 %vm1759_vm0, %v1758_v0  ;;  %v1490_v5 = vld [vmem:[#allocation8 + $0x8] sm:$0xff]   ;;  %v1491_v7 = vld [vmem:[#allocation11] sm:$0xff]   ;;  %s1760_s27 = smov 112   ;;  %s1761_s29 = smov 120   ;;  %vm614_vm3 = vcmask 130048   ;;  %vm1015_vm4 = vcmask 195584  }
  0xc2   : > { %1299 = vmatpush3.bf16.msra.mxu0 %v1486_v1  ;;  %1307 = vmatpush3.bf16.msra.mxu1 %v1491_v7  ;;  %v1492_v8 = vld [vmem:[#allocation11 + $0x8] sm:$0xff]   ;;  %s1762_s8 = smov 104   ;;  %s1763_s15 = smov 8   ;;  %vm1077_vm5 = vcmask 257024  }
  0xc3   : > { %1300 = vmatprep.subr.bf16.mxu0 %v1758_v0  ;;  %1308 = vmatprep.subr.bf16.mxu1 %v1758_v0  ;;  %s1764_s2 = smov 16   ;;  %s1765_s14 = smov 24  }
  0xc4   : > { %s1266_s18 = sshll.u32 %s1741_s24, 6  ;;  %s366_s9 = scalar_lea.vmem [#allocation12], %s1239_s3 }
  0xc5   : > { %s1094_s17 = sshll.u32 %s366_s9, 4  ;;  %s2166_s0 = scalar_lea.hbm %s2221_s6, %s1266_s18  ;;  %s2168_s17 = int_to_ptr.vmem [resolvable:$true] %s1094_s17 }
  0xc6   : > { %1301 = vmatpush3.bf16.msra.mxu0 %v1487_v2  ;;  %1309 = vmatpush3.bf16.msra.mxu1 %v1492_v8  ;;  %s1080_s24 = scalar_lea.sflag [#allocation5], %s2053_s4  ;;  %s1655_s3 = scalar_lea.vmem %s2168_s17, 64 }
  0xc7   : > { %1314 = vmatprep.subr.bf16.mxu0 %v1758_v0  ;;  %1322 = vmatprep.subr.bf16.mxu1 %v1758_v0  ;;  %p1656_p0 = scmp.ne.s32.totalorder %s2168_s17, %s1655_s3  ;;  %p2257_p2 = scmp.ne.s32.totalorder %s2245_s30, 0 }
  0xc8   : > { %s1766_s7 = smov [#allocation12]  }
  0xc9   : > { %1303 = vmatmul.mubr.msk.bf16.vlgmr.msra.gmra.mrb[0].mxu0 %vm395_vm1, %v1488_v3  ;;  %1311 = vmatmul.mubr.msk.bf16.vlgmr.msra.gmra.mrb[0].mxu1 %vm395_vm1, %v1488_v3  ;;  %p1657_p4 = pnand %p1656_p0, %p2257_p2  ;;  %s1659_s21 = sshll.u32 %s1766_s7, 4  ;;  %s1660_s21 = int_to_ptr.vmem [resolvable:$false] %s1659_s21 }
  0xca   : > { %1315 = vmatpush3.bf16.msra.mxu0 %v1489_v4  ;;  %1318 = vmatprep.mubr.msk.bf16.mxu0 %vm1759_vm0, %v1758_v0  ;;  %p1662_p1 = scmp.lt.s32.totalorder %s2168_s17, %s1660_s21 }
  0xcb   : > { %1316 = vmatprep.subr.bf16.mxu0 %v1758_v0  ;;  %1324 = vmatprep.mubr.msk.bf16.mxu1 %vm1759_vm0, %v1758_v0  ;;  %p1658_p8 = pneg %p1657_p4 }
  0xce   : > { %1317 = vmatpush3.bf16.msra.mxu0 %v1490_v5 }
  0xcf   : > { %1328 = vmatprep.subr.bf16.mxu0 %v1758_v0 }
  0xd1   : > { %1319 = vmatmul.mubr.msk.bf16.vlgmr.msra.gmra.mrb[4].mxu0 %vm395_vm1, %v502_v6 }
  0xd2   : > { %1330 = vmatprep.mubr.msk.bf16.mxu0 %vm1759_vm0, %v1758_v0 }
 0x19c   : > { %v433_v9 = vpop.f32.mrb[0].mxu0  ;;  %v492_v21 = vpop.f32.mrb[0].mxu1 }
 0x19d   : > { %v1304_v10 = vpop.f32.mrb[1].mxu0  ;;  %v1312_v22 = vpop.f32.mrb[1].mxu1 }
 0x19e   : > { %v436_v11 = vpop.f32.mrb[2].mxu0  ;;  %v495_v23 = vpop.f32.mrb[2].mxu1 }
 0x19f   : > { %v440_v12 = vpack.c.bf16 %v436_v11, %v433_v9  ;;  %v1305_v13 = vpop.f32.mrb[3].mxu0  ;;  %v499_v24 = vpack.c.bf16 %v495_v23, %v492_v21  ;;  %v1313_v25 = vpop.f32.mrb[3].mxu1 }
 0x1a1   : > { %441 = vst.msk [vmem:[#allocation2] sm:$0xff] %vm395_vm1, %v440_v12  ;;  %501 = vst.msk [vmem:[#allocation2 + $0x8] sm:$0xff] %vm395_vm1, %v499_v24 }
 0x1a4   : > { %v557_v14 = vpop.f32.mrb[4].mxu0 }
 0x1a5   : > { %v1320_v15 = vpop.f32.mrb[5].mxu0  ;;  %v563_v19 = vpack.c.bf16 %v557_v14, %v557_v14 }
 0x1a6   : > { %v560_v16 = vpop.f32.mrb[6].mxu0 }
 0x1a7   : > { %v1321_v17 = vpop.f32.mrb[7].mxu0 }
 0x1a8   : > { %v564_v18 = vld [vmem:[#allocation2] sm:$0xff]  ;;  %v566_v26 = vld [vmem:[#allocation2 + $0x8] sm:$0xff] }
 0x1a9   : > { %785 = vrot.lane.b32.xlu1 %v564_v18, %s1760_s27  ;;  %675 = vrot.lane.b32.xlu0 %v564_v18, %s1761_s29  ;;  %v572_v20 = vsel %vm567_vm2, %v564_v18, 0 }
 0x1aa   : > { %1323 = vmatpush3.bf16.xpose.msra.mxu1 %v572_v20  ;;  %1329 = vmatpush3.bf16.msra.mxu0 %v566_v26 }
 0x1ab   : > { %1334 = vmatprep.subr.bf16.mxu1 %v1758_v0  ;;  %1340 = vmatprep.subr.bf16.mxu0 %v1758_v0 }
 0x1ad   : > { %783 = vrot.lane.b32.xlu1 %v563_v19, %s1760_s27  ;;  %672 = vrot.lane.b32.xlu0 %v563_v19, %s1761_s29 }
 0x1b1   : > { %892 = vrot.lane.b32.xlu1 %v563_v19, %s1762_s8  ;;  %894 = vrot.lane.b32.xlu0 %v564_v18, %s1762_s8 }
 0x1b2   : > { %1325 = vmatmul.mubr.msk.bf16.vlgmr.msra.gmra.mrb[4].mxu1 %vm567_vm2, %v563_v19 }
 0x1b3   : > { %1336 = vmatprep.mubr.msk.bf16.mxu1 %vm1759_vm0, %v1758_v0 }
 0x21b   : > { %v676_v27 = vpop.permute.xlu0 %675  ;;  %v786_v29 = vpop.permute.xlu1 %785 }
 0x21c   : > { %v681_v28 = vsel %vm567_vm2, %v676_v27, 0  ;;  %v791_v31 = vsel %vm567_vm2, %v786_v29, 0 }
 0x21d   : > { %1335 = vmatpush3.bf16.xpose.msra.mxu1 %v681_v28  ;;  %v1493_v28 = vld [vmem:[%s2220_s5] sm:$0xff]  }
 0x21e   : > { %1346 = vmatprep.subr.bf16.mxu1 %v1758_v0 }
 0x21f   : > { %v673_v30 = vpop.permute.xlu0 %672  ;;  %v784_v33 = vpop.permute.xlu1 %783 }
 0x223   : > { %v895_v32 = vpop.permute.xlu0 %894  ;;  %v893_v35 = vpop.permute.xlu1 %892 }
 0x224   : > { %1337 = vmatmul.mubr.msk.bf16.vlgmr.msra.gmra.mrb[8].mxu1 %vm567_vm2, %v673_v30  ;;  %v900_v34 = vsel %vm567_vm2, %v895_v32, 0  ;;  %v1494_v32 = vld [vmem:[%s2220_s5 + $0x8] sm:$0xff]  }
 0x225   : > { %1347 = vmatpush3.bf16.xpose.msra.mxu1 %v791_v31  ;;  %1348 = vmatprep.mubr.msk.bf16.mxu1 %vm1759_vm0, %v1758_v0 }
 0x226   : > { %1358 = vmatprep.subr.bf16.mxu1 %v1758_v0 }
 0x22c   : > { %1349 = vmatmul.mubr.msk.bf16.vlgmr.msra.gmra.mrb[12].mxu1 %vm567_vm2, %v784_v33 }
 0x22d   : > { %1359 = vmatpush3.bf16.xpose.msra.mxu1 %v900_v34  ;;  %1360 = vmatprep.mubr.msk.bf16.mxu1 %vm1759_vm0, %v1758_v0 }
 0x22e   : > { %1370 = vmatprep.subr.bf16.mxu1 %v1758_v0 }
 0x234   : > { %1361 = vmatmul.mubr.msk.bf16.vlgmr.msra.gmra.mrb[16].mxu1 %vm567_vm2, %v893_v35 }
 0x235   : > { %1374 = vmatprep.mubr.msk.bf16.mxu1 %vm1759_vm0, %v1758_v0  ;;  %1371 = vmatpush3.bf16.msra.mxu1 %v1493_v28 }
 0x236   : > { %1372 = vmatprep.subr.bf16.mxu1 %v1758_v0 }
 0x239   : > { %1373 = vmatpush3.bf16.msra.mxu1 %v1494_v32 }
 0x285   : > { %v608_v36 = vpop.f32.mrb[4].mxu1 }
 0x286   : > { %v1326_v37 = vpop.f32.mrb[5].mxu1  ;;  %v615_v38 = vsel %vm614_vm3, %v608_v36, -inf }
 0x287   : > { %616 = vmax.xlane.f32.xlu0 %v615_v38  ;;  %v611_v39 = vpop.f32.mrb[6].mxu1 }
 0x288   : > { %v1327_v40 = vpop.f32.mrb[7].mxu1 }
 0x2f7   : > { %v717_v41 = vpop.f32.mrb[8].mxu1 }
 0x2f8   : > { %v1338_v42 = vpop.f32.mrb[9].mxu1  ;;  %v723_v43 = vsel %vm614_vm3, %v717_v41, -inf }
 0x2f9   : > { %724 = vmax.xlane.f32.xlu1 %v723_v43  ;;  %v720_v44 = vpop.f32.mrb[10].mxu1 }
 0x2fa   : > { %v1339_v45 = vpop.f32.mrb[11].mxu1 }
 0x2ff   : > { %v827_v46 = vpop.f32.mrb[12].mxu1 }
 0x300   : > { %v1350_v47 = vpop.f32.mrb[13].mxu1  ;;  %v833_v48 = vsel %vm614_vm3, %v827_v46, -inf }
 0x301   : > { %834 = vmax.xlane.f32.xlu0 %v833_v48  ;;  %v830_v49 = vpop.f32.mrb[14].mxu1 }
 0x302   : > { %v1351_v50 = vpop.f32.mrb[15].mxu1 }
 0x307   : > { %v936_v51 = vpop.f32.mrb[16].mxu1 }
 0x308   : > { %v1362_v52 = vpop.f32.mrb[17].mxu1  ;;  %v942_v53 = vsel %vm614_vm3, %v936_v51, -inf }
 0x309   : > { %943 = vmax.xlane.f32.xlu0 %v942_v53  ;;  %v939_v54 = vpop.f32.mrb[18].mxu1 }
 0x30a   : > { %734 = vrot.lane.b32.xlu1 %v566_v26, %s1761_s29  ;;  %v1363_v55 = vpop.f32.mrb[19].mxu1 }
 0x30e   : > { %952 = vrot.lane.b32.xlu1 %v566_v26, %s1762_s8 }
 0x314   : > { %v617_v56 = vpop.xlane.xlu0 %616 }
 0x315   : > { %v618_v57 = vsub.f32 %v608_v36, %v617_v56 }
 0x317   : > { %v619_v58 = vmul.f32 1.442695, %v618_v57 }
 0x319   : > { %1495 = vpow2.f32 %v619_v58 }
 0x31f   : > { %843 = vrot.lane.b32.xlu0 %v566_v26, %s1760_s27  ;;  %s1661_s27 = scalar_lea.vmem %s1660_s21, 128 }
 0x320   : > { %p1663_p13 = scmp.lt.s32.totalorder %s1661_s27, %s1655_s3 }
 0x322   : > { %p1664_p3 = por %p1663_p13, %p1662_p1 }
 0x323   : > { %v1496_v59 = vpop.eup %1495 }
 0x324   : > { %v624_v60 = vpack.c.bf16 %v1496_v59, %v1496_v59  ;;  %v621_v12 = vsel %vm614_vm3, %v1496_v59, 0.0  ;;  %p1665_p5 = pnand %p1664_p3, %p1658_p8 }
 0x326   : > { %1331 = vmatmul.mubr.msk.bf16.vlgmr.msra.gmra.mrb[8].mxu0 %vm614_vm3, %v624_v60 }
 0x327   : > { %1342 = vmatprep.mubr.msk.bf16.mxu0 %vm1759_vm0, %v1758_v0 }
 0x386   : > { %v725_v61 = vpop.xlane.xlu1 %724 }
 0x387   : > { %v726_v62 = vsub.f32 %v717_v41, %v725_v61 }
 0x389   : > { %v727_v63 = vmul.f32 1.442695, %v726_v62 }
 0x38a   : > { %v735_v1 = vpop.permute.xlu1 %734 }
 0x38b   : > { %1497 = vpow2.f32 %v727_v63  ;;  %1341 = vmatpush3.bf16.msra.mxu0 %v735_v1 }
 0x38c   : > { %1352 = vmatprep.subr.bf16.mxu0 %v1758_v0 }
 0x38e   : > { %v835_v2 = vpop.xlane.xlu0 %834  ;;  %v953_v16 = vpop.permute.xlu1 %952 }
 0x38f   : > { %v836_v3 = vsub.f32 %v827_v46, %v835_v2 }
 0x391   : > { %v837_v4 = vmul.f32 1.442695, %v836_v3 }
 0x393   : > { %1499 = vpow2.f32 %v837_v4 }
 0x395   : > { %v1498_v5 = vpop.eup %1497 }
 0x396   : > { %v944_v6 = vpop.xlane.xlu0 %943  ;;  %v729_v7 = vsel %vm614_vm3, %v1498_v5, 0.0  ;;  %v732_v8 = vpack.c.bf16 %v1498_v5, %v1498_v5 }
 0x397   : > { %v945_v9 = vsub.f32 %v936_v51, %v944_v6  ;;  %730 = vadd.xlane.f32.xlu1 %v729_v7 }
 0x398   : > { %1343 = vmatmul.mubr.msk.bf16.vlgmr.msra.gmra.mrb[12].mxu0 %vm614_vm3, %v732_v8 }
 0x399   : > { %v946_v10 = vmul.f32 1.442695, %v945_v9  ;;  %1354 = vmatprep.mubr.msk.bf16.mxu0 %vm1759_vm0, %v1758_v0 }
 0x39a   : > { %v844_v11 = vpop.permute.xlu0 %843 }
 0x39b   : > { %1501 = vpow2.f32 %v946_v10  ;;  %622 = vadd.xlane.f32.xlu1 %v621_v12  ;;  %1353 = vmatpush3.bf16.msra.mxu0 %v844_v11 }
 0x39c   : > { %1364 = vmatprep.subr.bf16.mxu0 %v1758_v0 }
 0x39d   : > { %v1500_v13 = vpop.eup %1499 }
 0x39e   : > { %v839_v14 = vsel %vm614_vm3, %v1500_v13, 0.0  ;;  %v842_v15 = vpack.c.bf16 %v1500_v13, %v1500_v13 }
 0x39f   : > { %840 = vadd.xlane.f32.xlu0 %v839_v14 }
 0x3a0   : > { %1355 = vmatmul.mubr.msk.bf16.vlgmr.msra.gmra.mrb[16].mxu0 %vm614_vm3, %v842_v15 }
 0x3a1   : > { %1365 = vmatpush3.bf16.msra.mxu0 %v953_v16  ;;  %1366 = vmatprep.mubr.msk.bf16.mxu0 %vm1759_vm0, %v1758_v0 }
 0x3a5   : > { %v1502_v17 = vpop.eup %1501 }
 0x3a6   : > { %v948_v18 = vsel %vm614_vm3, %v1502_v17, 0.0  ;;  %v951_v19 = vpack.c.bf16 %v1502_v17, %v1502_v17 }
 0x3a7   : > { %949 = vadd.xlane.f32.xlu0 %v948_v18 }
 0x3a8   : > { %1367 = vmatmul.mubr.msk.bf16.vlgmr.msra.gmra.mrb[20].mxu0 %vm614_vm3, %v951_v19 }
 0x3f9   : > { %v662_v20 = vpop.f32.mrb[8].mxu0 }
 0x3fa   : > { %v1332_v21 = vpop.f32.mrb[9].mxu0 }
 0x3fb   : > { %v665_v22 = vpop.f32.mrb[10].mxu0 }
 0x3fc   : > { %v1333_v23 = vpop.f32.mrb[11].mxu0 }
 0x424   : > { %v731_v24 = vpop.xlane.xlu1 %730 }
 0x425   : > { %1503 = vrcp.f32 %v731_v24 }
 0x428   : > { %v623_v49 = vpop.xlane.xlu1 %622 }
 0x42c   : > { %v841_v25 = vpop.xlane.xlu0 %840 }
 0x42d   : > { %1505 = vrcp.f32 %v841_v25 }
 0x42f   : > { %v1504_v26 = vpop.eup %1503 }
 0x434   : > { %v950_v33 = vpop.xlane.xlu0 %949 }
 0x435   : > { %1507 = vrcp.f32 %v950_v33 }
 0x436   : > { %1509 = vrcp.f32 %v623_v49 }
 0x437   : > { %v1506_v36 = vpop.eup %1505 }
 0x43f   : > { %v1508_v43 = vpop.eup %1507 }
 0x440   : > { %v1510_v50 = vpop.eup %1509 }
 0x441   : > { %v669_v51 = vmul.f32 %v1510_v50, %v662_v20 }
 0x443   : > { %v670_v54 = vpack.c.bf16 %v669_v51, %v669_v51 }
 0x46b   : > { %v774_v27 = vpop.f32.mrb[12].mxu0 }
 0x46c   : > { %v781_v29 = vmul.f32 %v1504_v26, %v774_v27  ;;  %v1344_v30 = vpop.f32.mrb[13].mxu0 }
 0x46d   : > { %v777_v31 = vpop.f32.mrb[14].mxu0 }
 0x46e   : > { %v782_v34 = vpack.c.bf16 %v781_v29, %v781_v29  ;;  %v1345_v35 = vpop.f32.mrb[15].mxu0 }
 0x470   : > { %1002 = vrot.lane.b32.xlu0 %v782_v34, %s1763_s15 }
 0x473   : > { %v883_v37 = vpop.f32.mrb[16].mxu0 }
 0x474   : > { %v890_v38 = vmul.f32 %v1506_v36, %v883_v37  ;;  %v1356_v39 = vpop.f32.mrb[17].mxu0 }
 0x475   : > { %v886_v40 = vpop.f32.mrb[18].mxu0 }
 0x476   : > { %v891_v41 = vpack.c.bf16 %v890_v38, %v890_v38  ;;  %v1357_v42 = vpop.f32.mrb[19].mxu0 }
 0x478   : > { %1005 = vrot.lane.b32.xlu1 %v891_v41, %s1764_s2 }
 0x47b   : > { %v992_v44 = vpop.f32.mrb[20].mxu0 }
 0x47c   : > { %v999_v45 = vmul.f32 %v1508_v43, %v992_v44  ;;  %v1368_v46 = vpop.f32.mrb[21].mxu0 }
 0x47d   : > { %v995_v47 = vpop.f32.mrb[22].mxu0 }
 0x47e   : > { %v1000_v48 = vpack.c.bf16 %v999_v45, %v999_v45  ;;  %v1369_v0 = vpop.f32.mrb[23].mxu0 }
 0x480   : > { %1008 = vrot.lane.b32.xlu1 %v1000_v48, %s1765_s14 }
 0x4e2   : > { %v1003_v52 = vpop.permute.xlu0 %1002 }
 0x4e3   : > { %v1012_v55 = vsel %vm567_vm2, %v670_v54, %v1003_v52 }
 0x4ea   : > { %v1006_v53 = vpop.permute.xlu1 %1005 }
 0x4eb   : > { %v1014_v56 = vsel %vm614_vm3, %v1012_v55, %v1006_v53 }
 0x4f2   : > { %v1009_v57 = vpop.permute.xlu1 %1008 }
 0x4f3   : > { %v1017_v58 = vsel %vm1015_vm4, %v1014_v56, %v1009_v57 }
 0x4f4   : > { %1375 = vmatmul.mubr.msk.bf16.vlgmr.msra.gmra.mrb[20].mxu1 %vm395_vm1, %v1017_v58 }
 0x5c7   : > { %v1070_v59 = vpop.f32.mrb[20].mxu1 }
 0x5c8   : > { %v1076_v60 = vpack.c.bf16 %v1070_v59, %v1070_v59  ;;  %v1376_v61 = vpop.f32.mrb[21].mxu1 }
 0x5c9   : > { %v1073_v62 = vpop.f32.mrb[22].mxu1 }
 0x5ca   : > { %v1377_v63 = vpop.f32.mrb[23].mxu1  ;;  %1078 = vst.msk [vmem:[%s366_s9] sm:$0xf] %vm1077_vm5, %v1076_v60 }
 0x5cb   : > { %1668 = shalt.err (!%p1665_p5)
}
 0x5cc   : > { %s1669_s4 = scalar_lea.hbm %s2166_s0, 64  ;;  %s1673_s11 = scalar_lea.hbm %s2221_s6, 128 }
 0x5cd   : > { %p1670_p6 = scmp.ne.s32.totalorder %s2166_s0, %s1669_s4  ;;  %p1674_p7 = scmp.lt.u32.totalorder %s2166_s0, %s2221_s6 }
 0x5ce   : > { %p1675_p11 = scmp.lt.u32.totalorder %s1673_s11, %s1669_s4  ;;  %p1677_p0 = scmp.lt.u32.totalorder %s1669_s4, %s2166_s0 }
 0x5cf   : > { %p1671_p12 = pnand %p1670_p6, %p2257_p2 }
 0x5d0   : > { %p1676_p9 = por %p1675_p11, %p1674_p7 }
 0x5d1   : > { %p1672_p10 = pneg %p1671_p12 }
 0x5d2   : > { %p1678_p4 = por %p1677_p0, %p1676_p9 }
 0x5d4   : > { %p1679_p8 = pnand %p1678_p4, %p1672_p10 }
 0x5d6   : > { %1682 = shalt.err (!%p1679_p8)
}
 0x5d7   : > { %1394 = dma.vmem_to_hbm [thread:$0]  (%p2257_p2), %s2168_s17, 64, %s2166_s0, %s1080_s24  }
 0x5d8 PF: > { %s2258_s16 = sld [smem:[#allocation18_spill]]  ;;  %s2259_s15 = sld [smem:[#allocation19_spill]] }
 0x5d9   : > { %p2261_p13 = scmp.ge.s32.totalorder %s1749_s26, 2 }
 0x5de   : > { %s1106_s2 = sand.u32 1, %s2258_s16   ;;  %p2260_p1 = scmp.ne.s32.totalorder %s2259_s15, 0 }
 0x5df   : > { %s1107_s14 = scalar_lea.sflag [#allocation5], %s1106_s2 }
 0x5e0   : > { %p1414_p3 = pnand %p2261_p13, %p2260_p1 }
 0x5e2   : > { %1724 = dma.done.wait (!%p1414_p3), %s1107_s14, 64  }
 0x5e3   : > { %1726 = vsyncadd (!%p1414_p3), %s1107_s14, 4294967232  ;;  %s26_s26 = sadd.s32 1, %s1749_s26   ;;  %s2262_s21 = smov %s1733_s22 }
 0x5e4   : > { %p23_p5 = scmp.ge.s32.totalorder %s26_s26, 4   ;;  %s2263_s22 = smov %s1737_s23 }
 0x5e5   : > { %s2264_s23 = smov %s1973_s19  ;;  %s2265_s24 = smov %s1745_s25 }
 0x5e6   : > { %s2266_s25 = smov %s2268_s10  ;;  %25 = sbr.rel (!%p23_p5) target bundleno = 14 (0xe), region = 120 }
 0x5ed   :  { %1112 = vsyncpa [#allocation4], 1 }
 0x5ee   :  { %1114 = vsyncpa [#allocation4 + $0x1], 1 }
 0x5ef   :  { %1115 = vsyncpa [#allocation7], 1 }
 0x5f0   :  { %1117 = vsyncpa [#allocation7 + $0x1], 1 }
 0x5f1   :  { %1118 = vsyncpa [#allocation10], 1 }
 0x5f2   :  { %1119 = vsyncpa [#allocation5], 1 }
 0x5f3   :  { %1121 = vsyncpa [#allocation5 + $0x1], 1 }

</bundles_post_ra>
